<compile_context>
chip_gen: v7x
topology: tpu7x:2x2x1
jax: 0.10.0
libtpu: 0.0.40
codegen_flags: <defaults>
</compile_context>

<pallas_src>
import functools

import jax
import jax.numpy as jnp
from jax import lax
from jax.experimental import pallas as pl
from jax.experimental.pallas import tpu as pltpu


def _silu(x):
    return x * jax.nn.sigmoid(x)


_TAPS = tuple((ky, kx) for ky in range(3) for kx in range(3))   # tap index k = ky*3 + kx


# --------------------------------------------------------------------------------------
# Pallas kernel: one image per grid step; both convs as 9 accumulated shifted matmuls.
# --------------------------------------------------------------------------------------
def sbottleneck_kernel(x_ref, w1_ref, b1_ref, w2_ref, b2_ref, mask_ref, o_ref,
                       y1_scr, *, H, W, add, mxu_dtype):
    C_ = w1_ref.shape[1]
    C2 = w2_ref.shape[1]
    Wp = W + 2
    P = (H + 2) * Wp          # flattened padded-grid size (lanes)
    M = Wp + 1                # max |flat offset| of a 3x3 tap -> zero-margin width

    w1 = w1_ref[...].astype(mxu_dtype)     # (9, C_, C1)
    w2 = w2_ref[...].astype(mxu_dtype)     # (9, C2, C_)
    mask = mask_ref[...]                   # (1, P): 1.0 on real pixels, 0.0 on the pad ring

    # ---- cv1 (+ folded BN, SiLU): 9 accumulated (C_ x C1) @ (C1 x P) MXU matmuls ----
    acc1 = jnp.zeros((C_, P), jnp.float32)
    x_center = None
    for k, (ky, kx) in enumerate(_TAPS):
        off = M + (ky - 1) * Wp + (kx - 1)
        xk = x_ref[:, off:off + P]                       # (C1, P) f32, static-offset slice
        if (ky, kx) == (1, 1):
            x_center = xk                                # reused by the residual add
        acc1 += jnp.dot(w1[k], xk.astype(mxu_dtype),
                        preferred_element_type=jnp.float32)
    y1 = _silu(acc1 + b1_ref[...]) * mask                # f32 VPU/EUP; pad ring forced to 0

    # ---- stage y1 in a zero-margined VMEM scratch (replaces jnp.pad of the intermediate) --
    y1_scr[...] = jnp.zeros_like(y1_scr)                 # tiny (C_, P+2M) store
    y1_scr[:, M:M + P] = y1

    # ---- cv2 (+ folded BN, SiLU): 9 accumulated (C2 x C_) @ (C_ x P) MXU matmuls ----
    acc2 = jnp.zeros((C2, P), jnp.float32)
    for k, (ky, kx) in enumerate(_TAPS):
        off = M + (ky - 1) * Wp + (kx - 1)
        yk = y1_scr[:, off:off + P]                      # (C_, P) f32
        acc2 += jnp.dot(w2[k], yk.astype(mxu_dtype),
                        preferred_element_type=jnp.float32)
    y2 = _silu(acc2 + b2_ref[...])

    # ---- residual shortcut: output = x + cv2(cv1(x)) when shortcut and c1 == c2 ----
    if add:
        y2 = y2 + x_center                               # pad-ring junk is cropped in wrapper

    o_ref[...] = y2                                      # (C2, P) lane-dense store


# --------------------------------------------------------------------------------------
# Wrapper
# --------------------------------------------------------------------------------------
def sbottleneck(x_nchw, params, *, add=True, mxu_dtype=jnp.bfloat16):
    """x_nchw: (N, C1, H, W) float32 (PyTorch layout). Returns (N, C2, H, W) float32."""
    N, C1, H, W = x_nchw.shape
    w1, b1, w2, b2 = params
    C_ = w1.shape[1]
    C2 = w2.shape[1]
    if add:
        assert C1 == C2, "residual add requires c1 == c2"

    Hp, Wp = H + 2, W + 2
    P = Hp * Wp
    M = Wp + 1
    Pe = P + 2 * M

    # NCHW -> zero-padded flat grid (N, C1, P): channels already on sublanes, flattened
    # spatial on lanes.  Add an M-wide zero margin on both flat ends so every in-kernel tap
    # read is a plain static-offset slice (no roll / pad / concat inside the kernel).
    xp = jnp.pad(x_nchw.astype(jnp.float32), ((0, 0), (0, 0), (1, 1), (1, 1)))
    xp = jnp.pad(xp.reshape(N, C1, P), ((0, 0), (0, 0), (M, M)))          # (N, C1, Pe)

    # Validity mask over the flattened padded grid (zeroes cv1's pad-ring outputs so cv2
    # sees true conv zero-padding).
    mask = jnp.zeros((Hp, Wp), jnp.float32).at[1:1 + H, 1:1 + W].set(1.0).reshape(1, P)

    kern = functools.partial(sbottleneck_kernel, H=H, W=W, add=add, mxu_dtype=mxu_dtype)
    out = pl.pallas_call(
        kern,
        out_shape=jax.ShapeDtypeStruct((N, C2, P), jnp.float32),
        grid=(N,),
        in_specs=[
            pl.BlockSpec((pl.Squeezed(), C1, Pe), lambda n: (n, 0, 0)),
            pl.BlockSpec((9, C_, C1), lambda n: (0, 0, 0)),   # resident across steps
            pl.BlockSpec((C_, 1), lambda n: (0, 0)),
            pl.BlockSpec((9, C2, C_), lambda n: (0, 0, 0)),
            pl.BlockSpec((C2, 1), lambda n: (0, 0)),
            pl.BlockSpec((1, P), lambda n: (0, 0)),
        ],
        out_specs=pl.BlockSpec((pl.Squeezed(), C2, P), lambda n: (n, 0, 0)),
        scratch_shapes=[pltpu.VMEM((C_, Pe), jnp.float32)],
        compiler_params=pltpu.CompilerParams(
            dimension_semantics=("parallel",),
            vmem_limit_bytes=48 * 1024 * 1024,
        ),
    )(xp, w1, b1, w2, b2, mask)

    # Crop the pad ring; result is already channel-major (NCHW), no transpose needed.
    return out.reshape(N, C2, Hp, Wp)[:, :, 1:1 + H, 1:1 + W]


# --------------------------------------------------------------------------------------
# Parameters: synthetic conv + BN, BN folded; weights in tap-major (9, Cout, Cin) layout.
# --------------------------------------------------------------------------------------
def make_params(key, c1, c2, e=0.5, eps=1e-3):
    c_ = int(c2 * e)
    keys = jax.random.split(key, 4)

    def bn_params(k, c):
        k1, k2, k3, k4 = jax.random.split(k, 4)
        gamma = 1.0 + 0.1 * jax.random.normal(k1, (c,), jnp.float32)
        beta = 0.1 * jax.random.normal(k2, (c,), jnp.float32)
        mean = 0.1 * jax.random.normal(k3, (c,), jnp.float32)
        var = jnp.abs(1.0 + 0.1 * jax.random.normal(k4, (c,), jnp.float32))
        return gamma, beta, mean, var

    def fold(w_oihw, bnp):
        gamma, beta, mean, var = bnp
        scale = gamma / jnp.sqrt(var + eps)
        return w_oihw * scale[:, None, None, None], beta - mean * scale

    def to_taps(w_oihw):
        # OIHW -> (kh, kw, Cout, Cin) -> (9, Cout, Cin); tap index k = ky*3 + kx.
        o, i = w_oihw.shape[0], w_oihw.shape[1]
        return jnp.transpose(w_oihw, (2, 3, 0, 1)).reshape(9, o, i)

    w1 = 0.1 * jax.random.normal(keys[0], (c_, c1, 3, 3), jnp.float32)
    w1, b1 = fold(w1, bn_params(keys[1], c_))
    w2 = 0.1 * jax.random.normal(keys[2], (c2, c_, 3, 3), jnp.float32)
    w2, b2 = fold(w2, bn_params(keys[3], c2))

    return (to_taps(w1), b1[:, None], to_taps(w2), b2[:, None])


# --------------------------------------------------------------------------------------
# Pure-JAX reference (lax conv, same bf16-operand / f32-accumulate contract as the kernel).
# --------------------------------------------------------------------------------------
def ref_forward(x_nchw, params, *, add=True, mxu_dtype=jnp.bfloat16):
    w1, b1, w2, b2 = params
    x = jnp.transpose(x_nchw, (0, 2, 3, 1)).astype(jnp.float32)       # NHWC
    dn = ("NHWC", "HWIO", "NHWC")

    def conv3x3(z, w_taps, b):
        cout, cin = w_taps.shape[1], w_taps.shape[2]
        w_hwio = jnp.transpose(w_taps.reshape(3, 3, cout, cin), (0, 1, 3, 2))
        y = lax.conv_general_dilated(z.astype(mxu_dtype), w_hwio.astype(mxu_dtype),
                                     (1, 1), ((1, 1), (1, 1)), dimension_numbers=dn,
                                     preferred_element_type=jnp.float32)
        return y + b[:, 0]

    y = _silu(conv3x3(x, w1, b1))
    y = _silu(conv3x3(y, w2, b2))
    out = x + y if add else y
    return jnp.transpose(out, (0, 3, 1, 2))


if __name__ == "__main__":
    key = jax.random.PRNGKey(0)
    kx, kp = jax.random.split(key)

    # SBottleneck_spike(c1=4, c2=4, spk_conv_li=[], shortcut=True, k=(3,3), e=0.5)
    #   -> cv1: Conv(4, 2, 3), cv2: Conv(2, 4, 3), residual add (c1 == c2).
    N, C1, H, W = 2, 4, 16, 16
    C2, E = 4, 0.5

    x = jax.random.normal(kx, (N, C1, H, W), jnp.float32)
    params = make_params(kp, C1, C2, e=E)

    out = jax.block_until_ready(sbottleneck(x, params, add=True))
    ref = ref_forward(x, params, add=True)

    assert out.shape == ref.shape == (N, C2, H, W), (out.shape, ref.shape)
    max_err = float(jnp.max(jnp.abs(out - ref)))
    assert jnp.allclose(out, ref, atol=5e-3, rtol=5e-3), max_err

    print("KERNEL_OK")
</pallas_src>

<mosaic_0001>
module attributes {stable_mosaic.version = 11 : i64} {
  func.func @sbottleneck_kernel(%arg0: i32, %arg1: memref<1x4x362xf32, #tpu.memory_space<vmem>>, %arg2: memref<9x2x4xf32, #tpu.memory_space<vmem>>, %arg3: memref<2x1xf32, #tpu.memory_space<vmem>>, %arg4: memref<9x4x2xf32, #tpu.memory_space<vmem>>, %arg5: memref<4x1xf32, #tpu.memory_space<vmem>>, %arg6: memref<1x324xf32, #tpu.memory_space<vmem>>, %arg7: memref<1x4x324xf32, #tpu.memory_space<vmem>>, %arg8: memref<2x362xf32, #tpu.memory_space<vmem>>) attributes {dimension_semantics = [#tpu.dimension_semantics<parallel>], iteration_bounds = array<i64: 2>, scalar_prefetch = 0 : i64, scratch_operands = 1 : i64, tpu.core_type = #tpu.core_type<tc>, window_params = [{transform_indices = @transform_0, window_bounds = array<i64: 1, 4, 362>}, {pipeline_mode = #tpu.pipeline_mode<synchronous>, transform_indices = @transform_1, window_bounds = array<i64: 9, 2, 4>}, {pipeline_mode = #tpu.pipeline_mode<synchronous>, transform_indices = @transform_2, window_bounds = array<i64: 2, 1>}, {pipeline_mode = #tpu.pipeline_mode<synchronous>, transform_indices = @transform_3, window_bounds = array<i64: 9, 4, 2>}, {pipeline_mode = #tpu.pipeline_mode<synchronous>, transform_indices = @transform_4, window_bounds = array<i64: 4, 1>}, {pipeline_mode = #tpu.pipeline_mode<synchronous>, transform_indices = @transform_5, window_bounds = array<i64: 1, 324>}, {transform_indices = @transform_6, window_bounds = array<i64: 1, 4, 324>}]} {
    %c0 = arith.constant 0 : index
    %c0_0 = arith.constant 0 : index
    %c0_1 = arith.constant 0 : index
    %0 = vector.load %arg2[%c0, %c0_0, %c0_1] : memref<9x2x4xf32, #tpu.memory_space<vmem>>, vector<9x2x4xf32>
    %1 = arith.truncf %0 : vector<9x2x4xf32> to vector<9x2x4xbf16>
    %c0_2 = arith.constant 0 : index
    %c0_3 = arith.constant 0 : index
    %c0_4 = arith.constant 0 : index
    %2 = vector.load %arg4[%c0_2, %c0_3, %c0_4] : memref<9x4x2xf32, #tpu.memory_space<vmem>>, vector<9x4x2xf32>
    %3 = arith.truncf %2 : vector<9x4x2xf32> to vector<9x4x2xbf16>
    %c0_5 = arith.constant 0 : index
    %c0_6 = arith.constant 0 : index
    %4 = vector.load %arg6[%c0_5, %c0_6] : memref<1x324xf32, #tpu.memory_space<vmem>>, vector<1x324xf32>
    %cst = arith.constant 0.000000e+00 : f32
    %5 = vector.broadcast %cst : f32 to vector<2x324xf32>
    %c0_7 = arith.constant 0 : index
    %c0_8 = arith.constant 0 : index
    %c0_9 = arith.constant 0 : index
    %6 = vector.load %arg1[%c0_7, %c0_8, %c0_9] : memref<1x4x362xf32, #tpu.memory_space<vmem>>, vector<1x4x324xf32>
    %7 = vector.shape_cast %6 : vector<1x4x324xf32> to vector<4x324xf32>
    %8 = vector.extract_strided_slice %1 {offsets = [0, 0, 0], sizes = [1, 2, 4], strides = [1, 1, 1]} : vector<9x2x4xbf16> to vector<1x2x4xbf16>
    %9 = vector.shape_cast %8 : vector<1x2x4xbf16> to vector<2x4xbf16>
    %10 = arith.truncf %7 : vector<4x324xf32> to vector<4x324xbf16>
    %cst_10 = arith.constant dense<0.000000e+00> : vector<2x324xf32>
    %11 = tpu.matmul %9, %10, %cst_10 {dimension_numbers = #tpu.dot_dimension_numbers<[1], [0], [0], [1], [0, 0, 1, 1], [], []>} : vector<2x4xbf16>, vector<4x324xbf16>, vector<2x324xf32> -> vector<2x324xf32>
    %12 = arith.addf %5, %11 : vector<2x324xf32>
    %c0_11 = arith.constant 0 : index
    %c0_12 = arith.constant 0 : index
    %c1 = arith.constant 1 : index
    %13 = vector.load %arg1[%c0_11, %c0_12, %c1] : memref<1x4x362xf32, #tpu.memory_space<vmem>>, vector<1x4x324xf32>
    %14 = vector.shape_cast %13 : vector<1x4x324xf32> to vector<4x324xf32>
    %15 = vector.extract_strided_slice %1 {offsets = [1, 0, 0], sizes = [1, 2, 4], strides = [1, 1, 1]} : vector<9x2x4xbf16> to vector<1x2x4xbf16>
    %16 = vector.shape_cast %15 : vector<1x2x4xbf16> to vector<2x4xbf16>
    %17 = arith.truncf %14 : vector<4x324xf32> to vector<4x324xbf16>
    %cst_13 = arith.constant dense<0.000000e+00> : vector<2x324xf32>
    %18 = tpu.matmul %16, %17, %cst_13 {dimension_numbers = #tpu.dot_dimension_numbers<[1], [0], [0], [1], [0, 0, 1, 1], [], []>} : vector<2x4xbf16>, vector<4x324xbf16>, vector<2x324xf32> -> vector<2x324xf32>
    %19 = arith.addf %12, %18 : vector<2x324xf32>
    %c0_14 = arith.constant 0 : index
    %c0_15 = arith.constant 0 : index
    %c2 = arith.constant 2 : index
    %20 = vector.load %arg1[%c0_14, %c0_15, %c2] : memref<1x4x362xf32, #tpu.memory_space<vmem>>, vector<1x4x324xf32>
    %21 = vector.shape_cast %20 : vector<1x4x324xf32> to vector<4x324xf32>
    %22 = vector.extract_strided_slice %1 {offsets = [2, 0, 0], sizes = [1, 2, 4], strides = [1, 1, 1]} : vector<9x2x4xbf16> to vector<1x2x4xbf16>
    %23 = vector.shape_cast %22 : vector<1x2x4xbf16> to vector<2x4xbf16>
    %24 = arith.truncf %21 : vector<4x324xf32> to vector<4x324xbf16>
    %cst_16 = arith.constant dense<0.000000e+00> : vector<2x324xf32>
    %25 = tpu.matmul %23, %24, %cst_16 {dimension_numbers = #tpu.dot_dimension_numbers<[1], [0], [0], [1], [0, 0, 1, 1], [], []>} : vector<2x4xbf16>, vector<4x324xbf16>, vector<2x324xf32> -> vector<2x324xf32>
    %26 = arith.addf %19, %25 : vector<2x324xf32>
    %c0_17 = arith.constant 0 : index
    %c0_18 = arith.constant 0 : index
    %c18 = arith.constant 18 : index
    %27 = vector.load %arg1[%c0_17, %c0_18, %c18] : memref<1x4x362xf32, #tpu.memory_space<vmem>>, vector<1x4x324xf32>
    %28 = vector.shape_cast %27 : vector<1x4x324xf32> to vector<4x324xf32>
    %29 = vector.extract_strided_slice %1 {offsets = [3, 0, 0], sizes = [1, 2, 4], strides = [1, 1, 1]} : vector<9x2x4xbf16> to vector<1x2x4xbf16>
    %30 = vector.shape_cast %29 : vector<1x2x4xbf16> to vector<2x4xbf16>
    %31 = arith.truncf %28 : vector<4x324xf32> to vector<4x324xbf16>
    %cst_19 = arith.constant dense<0.000000e+00> : vector<2x324xf32>
    %32 = tpu.matmul %30, %31, %cst_19 {dimension_numbers = #tpu.dot_dimension_numbers<[1], [0], [0], [1], [0, 0, 1, 1], [], []>} : vector<2x4xbf16>, vector<4x324xbf16>, vector<2x324xf32> -> vector<2x324xf32>
    %33 = arith.addf %26, %32 : vector<2x324xf32>
    %c0_20 = arith.constant 0 : index
    %c0_21 = arith.constant 0 : index
    %c19 = arith.constant 19 : index
    %34 = vector.load %arg1[%c0_20, %c0_21, %c19] : memref<1x4x362xf32, #tpu.memory_space<vmem>>, vector<1x4x324xf32>
    %35 = vector.shape_cast %34 : vector<1x4x324xf32> to vector<4x324xf32>
    %36 = vector.extract_strided_slice %1 {offsets = [4, 0, 0], sizes = [1, 2, 4], strides = [1, 1, 1]} : vector<9x2x4xbf16> to vector<1x2x4xbf16>
    %37 = vector.shape_cast %36 : vector<1x2x4xbf16> to vector<2x4xbf16>
    %38 = arith.truncf %35 : vector<4x324xf32> to vector<4x324xbf16>
    %cst_22 = arith.constant dense<0.000000e+00> : vector<2x324xf32>
    %39 = tpu.matmul %37, %38, %cst_22 {dimension_numbers = #tpu.dot_dimension_numbers<[1], [0], [0], [1], [0, 0, 1, 1], [], []>} : vector<2x4xbf16>, vector<4x324xbf16>, vector<2x324xf32> -> vector<2x324xf32>
    %40 = arith.addf %33, %39 : vector<2x324xf32>
    %c0_23 = arith.constant 0 : index
    %c0_24 = arith.constant 0 : index
    %c20 = arith.constant 20 : index
    %41 = vector.load %arg1[%c0_23, %c0_24, %c20] : memref<1x4x362xf32, #tpu.memory_space<vmem>>, vector<1x4x324xf32>
    %42 = vector.shape_cast %41 : vector<1x4x324xf32> to vector<4x324xf32>
    %43 = vector.extract_strided_slice %1 {offsets = [5, 0, 0], sizes = [1, 2, 4], strides = [1, 1, 1]} : vector<9x2x4xbf16> to vector<1x2x4xbf16>
    %44 = vector.shape_cast %43 : vector<1x2x4xbf16> to vector<2x4xbf16>
    %45 = arith.truncf %42 : vector<4x324xf32> to vector<4x324xbf16>
    %cst_25 = arith.constant dense<0.000000e+00> : vector<2x324xf32>
    %46 = tpu.matmul %44, %45, %cst_25 {dimension_numbers = #tpu.dot_dimension_numbers<[1], [0], [0], [1], [0, 0, 1, 1], [], []>} : vector<2x4xbf16>, vector<4x324xbf16>, vector<2x324xf32> -> vector<2x324xf32>
    %47 = arith.addf %40, %46 : vector<2x324xf32>
    %c0_26 = arith.constant 0 : index
    %c0_27 = arith.constant 0 : index
    %c36 = arith.constant 36 : index
    %48 = vector.load %arg1[%c0_26, %c0_27, %c36] : memref<1x4x362xf32, #tpu.memory_space<vmem>>, vector<1x4x324xf32>
    %49 = vector.shape_cast %48 : vector<1x4x324xf32> to vector<4x324xf32>
    %50 = vector.extract_strided_slice %1 {offsets = [6, 0, 0], sizes = [1, 2, 4], strides = [1, 1, 1]} : vector<9x2x4xbf16> to vector<1x2x4xbf16>
    %51 = vector.shape_cast %50 : vector<1x2x4xbf16> to vector<2x4xbf16>
    %52 = arith.truncf %49 : vector<4x324xf32> to vector<4x324xbf16>
    %cst_28 = arith.constant dense<0.000000e+00> : vector<2x324xf32>
    %53 = tpu.matmul %51, %52, %cst_28 {dimension_numbers = #tpu.dot_dimension_numbers<[1], [0], [0], [1], [0, 0, 1, 1], [], []>} : vector<2x4xbf16>, vector<4x324xbf16>, vector<2x324xf32> -> vector<2x324xf32>
    %54 = arith.addf %47, %53 : vector<2x324xf32>
    %c0_29 = arith.constant 0 : index
    %c0_30 = arith.constant 0 : index
    %c37 = arith.constant 37 : index
    %55 = vector.load %arg1[%c0_29, %c0_30, %c37] : memref<1x4x362xf32, #tpu.memory_space<vmem>>, vector<1x4x324xf32>
    %56 = vector.shape_cast %55 : vector<1x4x324xf32> to vector<4x324xf32>
    %57 = vector.extract_strided_slice %1 {offsets = [7, 0, 0], sizes = [1, 2, 4], strides = [1, 1, 1]} : vector<9x2x4xbf16> to vector<1x2x4xbf16>
    %58 = vector.shape_cast %57 : vector<1x2x4xbf16> to vector<2x4xbf16>
    %59 = arith.truncf %56 : vector<4x324xf32> to vector<4x324xbf16>
    %cst_31 = arith.constant dense<0.000000e+00> : vector<2x324xf32>
    %60 = tpu.matmul %58, %59, %cst_31 {dimension_numbers = #tpu.dot_dimension_numbers<[1], [0], [0], [1], [0, 0, 1, 1], [], []>} : vector<2x4xbf16>, vector<4x324xbf16>, vector<2x324xf32> -> vector<2x324xf32>
    %61 = arith.addf %54, %60 : vector<2x324xf32>
    %c0_32 = arith.constant 0 : index
    %c0_33 = arith.constant 0 : index
    %c38 = arith.constant 38 : index
    %62 = vector.load %arg1[%c0_32, %c0_33, %c38] : memref<1x4x362xf32, #tpu.memory_space<vmem>>, vector<1x4x324xf32>
    %63 = vector.shape_cast %62 : vector<1x4x324xf32> to vector<4x324xf32>
    %64 = vector.extract_strided_slice %1 {offsets = [8, 0, 0], sizes = [1, 2, 4], strides = [1, 1, 1]} : vector<9x2x4xbf16> to vector<1x2x4xbf16>
    %65 = vector.shape_cast %64 : vector<1x2x4xbf16> to vector<2x4xbf16>
    %66 = arith.truncf %63 : vector<4x324xf32> to vector<4x324xbf16>
    %cst_34 = arith.constant dense<0.000000e+00> : vector<2x324xf32>
    %67 = tpu.matmul %65, %66, %cst_34 {dimension_numbers = #tpu.dot_dimension_numbers<[1], [0], [0], [1], [0, 0, 1, 1], [], []>} : vector<2x4xbf16>, vector<4x324xbf16>, vector<2x324xf32> -> vector<2x324xf32>
    %68 = arith.addf %61, %67 : vector<2x324xf32>
    %c0_35 = arith.constant 0 : index
    %c0_36 = arith.constant 0 : index
    %69 = vector.load %arg3[%c0_35, %c0_36] : memref<2x1xf32, #tpu.memory_space<vmem>>, vector<2x1xf32>
    %70 = vector.broadcast %69 : vector<2x1xf32> to vector<2x324xf32>
    %71 = arith.addf %68, %70 : vector<2x324xf32>
    %72 = arith.negf %71 : vector<2x324xf32>
    %73 = math.exp %72 : vector<2x324xf32>
    %cst_37 = arith.constant 1.000000e+00 : f32
    %74 = vector.broadcast %cst_37 : f32 to vector<2x324xf32>
    %75 = arith.addf %74, %73 : vector<2x324xf32>
    %76 = arith.divf %74, %75 : vector<2x324xf32>
    %77 = arith.mulf %71, %76 : vector<2x324xf32>
    %78 = vector.broadcast %4 : vector<1x324xf32> to vector<2x324xf32>
    %79 = arith.mulf %77, %78 : vector<2x324xf32>
    %cst_38 = arith.constant 0.000000e+00 : f32
    %80 = vector.broadcast %cst_38 : f32 to vector<2x362xf32>
    %c0_39 = arith.constant 0 : index
    %c0_40 = arith.constant 0 : index
    %81 = vector.load %arg8[%c0_39, %c0_40] : memref<2x362xf32, #tpu.memory_space<vmem>>, vector<2x362xf32>
    tpu.vector_store %arg8[%c0_39, %c0_40], %80 {strides = array<i32>} : memref<2x362xf32, #tpu.memory_space<vmem>>, vector<2x362xf32>,
    %c0_41 = arith.constant 0 : index
    %c19_42 = arith.constant 19 : index
    %82 = vector.load %arg8[%c0_41, %c19_42] : memref<2x362xf32, #tpu.memory_space<vmem>>, vector<2x324xf32>
    tpu.vector_store %arg8[%c0_41, %c19_42], %79 {strides = array<i32>} : memref<2x362xf32, #tpu.memory_space<vmem>>, vector<2x324xf32>,
    %cst_43 = arith.constant 0.000000e+00 : f32
    %83 = vector.broadcast %cst_43 : f32 to vector<4x324xf32>
    %c0_44 = arith.constant 0 : index
    %c0_45 = arith.constant 0 : index
    %84 = vector.load %arg8[%c0_44, %c0_45] : memref<2x362xf32, #tpu.memory_space<vmem>>, vector<2x324xf32>
    %85 = vector.extract_strided_slice %3 {offsets = [0, 0, 0], sizes = [1, 4, 2], strides = [1, 1, 1]} : vector<9x4x2xbf16> to vector<1x4x2xbf16>
    %86 = vector.shape_cast %85 : vector<1x4x2xbf16> to vector<4x2xbf16>
    %87 = arith.truncf %84 : vector<2x324xf32> to vector<2x324xbf16>
    %cst_46 = arith.constant dense<0.000000e+00> : vector<4x324xf32>
    %88 = tpu.matmul %86, %87, %cst_46 {dimension_numbers = #tpu.dot_dimension_numbers<[1], [0], [0], [1], [0, 0, 1, 1], [], []>} : vector<4x2xbf16>, vector<2x324xbf16>, vector<4x324xf32> -> vector<4x324xf32>
    %89 = arith.addf %83, %88 : vector<4x324xf32>
    %c0_47 = arith.constant 0 : index
    %c1_48 = arith.constant 1 : index
    %90 = vector.load %arg8[%c0_47, %c1_48] : memref<2x362xf32, #tpu.memory_space<vmem>>, vector<2x324xf32>
    %91 = vector.extract_strided_slice %3 {offsets = [1, 0, 0], sizes = [1, 4, 2], strides = [1, 1, 1]} : vector<9x4x2xbf16> to vector<1x4x2xbf16>
    %92 = vector.shape_cast %91 : vector<1x4x2xbf16> to vector<4x2xbf16>
    %93 = arith.truncf %90 : vector<2x324xf32> to vector<2x324xbf16>
    %cst_49 = arith.constant dense<0.000000e+00> : vector<4x324xf32>
    %94 = tpu.matmul %92, %93, %cst_49 {dimension_numbers = #tpu.dot_dimension_numbers<[1], [0], [0], [1], [0, 0, 1, 1], [], []>} : vector<4x2xbf16>, vector<2x324xbf16>, vector<4x324xf32> -> vector<4x324xf32>
    %95 = arith.addf %89, %94 : vector<4x324xf32>
    %c0_50 = arith.constant 0 : index
    %c2_51 = arith.constant 2 : index
    %96 = vector.load %arg8[%c0_50, %c2_51] : memref<2x362xf32, #tpu.memory_space<vmem>>, vector<2x324xf32>
    %97 = vector.extract_strided_slice %3 {offsets = [2, 0, 0], sizes = [1, 4, 2], strides = [1, 1, 1]} : vector<9x4x2xbf16> to vector<1x4x2xbf16>
    %98 = vector.shape_cast %97 : vector<1x4x2xbf16> to vector<4x2xbf16>
    %99 = arith.truncf %96 : vector<2x324xf32> to vector<2x324xbf16>
    %cst_52 = arith.constant dense<0.000000e+00> : vector<4x324xf32>
    %100 = tpu.matmul %98, %99, %cst_52 {dimension_numbers = #tpu.dot_dimension_numbers<[1], [0], [0], [1], [0, 0, 1, 1], [], []>} : vector<4x2xbf16>, vector<2x324xbf16>, vector<4x324xf32> -> vector<4x324xf32>
    %101 = arith.addf %95, %100 : vector<4x324xf32>
    %c0_53 = arith.constant 0 : index
    %c18_54 = arith.constant 18 : index
    %102 = vector.load %arg8[%c0_53, %c18_54] : memref<2x362xf32, #tpu.memory_space<vmem>>, vector<2x324xf32>
    %103 = vector.extract_strided_slice %3 {offsets = [3, 0, 0], sizes = [1, 4, 2], strides = [1, 1, 1]} : vector<9x4x2xbf16> to vector<1x4x2xbf16>
    %104 = vector.shape_cast %103 : vector<1x4x2xbf16> to vector<4x2xbf16>
    %105 = arith.truncf %102 : vector<2x324xf32> to vector<2x324xbf16>
    %cst_55 = arith.constant dense<0.000000e+00> : vector<4x324xf32>
    %106 = tpu.matmul %104, %105, %cst_55 {dimension_numbers = #tpu.dot_dimension_numbers<[1], [0], [0], [1], [0, 0, 1, 1], [], []>} : vector<4x2xbf16>, vector<2x324xbf16>, vector<4x324xf32> -> vector<4x324xf32>
    %107 = arith.addf %101, %106 : vector<4x324xf32>
    %c0_56 = arith.constant 0 : index
    %c19_57 = arith.constant 19 : index
    %108 = vector.load %arg8[%c0_56, %c19_57] : memref<2x362xf32, #tpu.memory_space<vmem>>, vector<2x324xf32>
    %109 = vector.extract_strided_slice %3 {offsets = [4, 0, 0], sizes = [1, 4, 2], strides = [1, 1, 1]} : vector<9x4x2xbf16> to vector<1x4x2xbf16>
    %110 = vector.shape_cast %109 : vector<1x4x2xbf16> to vector<4x2xbf16>
    %111 = arith.truncf %108 : vector<2x324xf32> to vector<2x324xbf16>
    %cst_58 = arith.constant dense<0.000000e+00> : vector<4x324xf32>
    %112 = tpu.matmul %110, %111, %cst_58 {dimension_numbers = #tpu.dot_dimension_numbers<[1], [0], [0], [1], [0, 0, 1, 1], [], []>} : vector<4x2xbf16>, vector<2x324xbf16>, vector<4x324xf32> -> vector<4x324xf32>
    %113 = arith.addf %107, %112 : vector<4x324xf32>
    %c0_59 = arith.constant 0 : index
    %c20_60 = arith.constant 20 : index
    %114 = vector.load %arg8[%c0_59, %c20_60] : memref<2x362xf32, #tpu.memory_space<vmem>>, vector<2x324xf32>
    %115 = vector.extract_strided_slice %3 {offsets = [5, 0, 0], sizes = [1, 4, 2], strides = [1, 1, 1]} : vector<9x4x2xbf16> to vector<1x4x2xbf16>
    %116 = vector.shape_cast %115 : vector<1x4x2xbf16> to vector<4x2xbf16>
    %117 = arith.truncf %114 : vector<2x324xf32> to vector<2x324xbf16>
    %cst_61 = arith.constant dense<0.000000e+00> : vector<4x324xf32>
    %118 = tpu.matmul %116, %117, %cst_61 {dimension_numbers = #tpu.dot_dimension_numbers<[1], [0], [0], [1], [0, 0, 1, 1], [], []>} : vector<4x2xbf16>, vector<2x324xbf16>, vector<4x324xf32> -> vector<4x324xf32>
    %119 = arith.addf %113, %118 : vector<4x324xf32>
    %c0_62 = arith.constant 0 : index
    %c36_63 = arith.constant 36 : index
    %120 = vector.load %arg8[%c0_62, %c36_63] : memref<2x362xf32, #tpu.memory_space<vmem>>, vector<2x324xf32>
    %121 = vector.extract_strided_slice %3 {offsets = [6, 0, 0], sizes = [1, 4, 2], strides = [1, 1, 1]} : vector<9x4x2xbf16> to vector<1x4x2xbf16>
    %122 = vector.shape_cast %121 : vector<1x4x2xbf16> to vector<4x2xbf16>
    %123 = arith.truncf %120 : vector<2x324xf32> to vector<2x324xbf16>
    %cst_64 = arith.constant dense<0.000000e+00> : vector<4x324xf32>
    %124 = tpu.matmul %122, %123, %cst_64 {dimension_numbers = #tpu.dot_dimension_numbers<[1], [0], [0], [1], [0, 0, 1, 1], [], []>} : vector<4x2xbf16>, vector<2x324xbf16>, vector<4x324xf32> -> vector<4x324xf32>
    %125 = arith.addf %119, %124 : vector<4x324xf32>
    %c0_65 = arith.constant 0 : index
    %c37_66 = arith.constant 37 : index
    %126 = vector.load %arg8[%c0_65, %c37_66] : memref<2x362xf32, #tpu.memory_space<vmem>>, vector<2x324xf32>
    %127 = vector.extract_strided_slice %3 {offsets = [7, 0, 0], sizes = [1, 4, 2], strides = [1, 1, 1]} : vector<9x4x2xbf16> to vector<1x4x2xbf16>
    %128 = vector.shape_cast %127 : vector<1x4x2xbf16> to vector<4x2xbf16>
    %129 = arith.truncf %126 : vector<2x324xf32> to vector<2x324xbf16>
    %cst_67 = arith.constant dense<0.000000e+00> : vector<4x324xf32>
    %130 = tpu.matmul %128, %129, %cst_67 {dimension_numbers = #tpu.dot_dimension_numbers<[1], [0], [0], [1], [0, 0, 1, 1], [], []>} : vector<4x2xbf16>, vector<2x324xbf16>, vector<4x324xf32> -> vector<4x324xf32>
    %131 = arith.addf %125, %130 : vector<4x324xf32>
    %c0_68 = arith.constant 0 : index
    %c38_69 = arith.constant 38 : index
    %132 = vector.load %arg8[%c0_68, %c38_69] : memref<2x362xf32, #tpu.memory_space<vmem>>, vector<2x324xf32>
    %133 = vector.extract_strided_slice %3 {offsets = [8, 0, 0], sizes = [1, 4, 2], strides = [1, 1, 1]} : vector<9x4x2xbf16> to vector<1x4x2xbf16>
    %134 = vector.shape_cast %133 : vector<1x4x2xbf16> to vector<4x2xbf16>
    %135 = arith.truncf %132 : vector<2x324xf32> to vector<2x324xbf16>
    %cst_70 = arith.constant dense<0.000000e+00> : vector<4x324xf32>
    %136 = tpu.matmul %134, %135, %cst_70 {dimension_numbers = #tpu.dot_dimension_numbers<[1], [0], [0], [1], [0, 0, 1, 1], [], []>} : vector<4x2xbf16>, vector<2x324xbf16>, vector<4x324xf32> -> vector<4x324xf32>
    %137 = arith.addf %131, %136 : vector<4x324xf32>
    %c0_71 = arith.constant 0 : index
    %c0_72 = arith.constant 0 : index
    %138 = vector.load %arg5[%c0_71, %c0_72] : memref<4x1xf32, #tpu.memory_space<vmem>>, vector<4x1xf32>
    %139 = vector.broadcast %138 : vector<4x1xf32> to vector<4x324xf32>
    %140 = arith.addf %137, %139 : vector<4x324xf32>
    %141 = arith.negf %140 : vector<4x324xf32>
    %142 = math.exp %141 : vector<4x324xf32>
    %cst_73 = arith.constant 1.000000e+00 : f32
    %143 = vector.broadcast %cst_73 : f32 to vector<4x324xf32>
    %144 = arith.addf %143, %142 : vector<4x324xf32>
    %145 = arith.divf %143, %144 : vector<4x324xf32>
    %146 = arith.mulf %140, %145 : vector<4x324xf32>
    %147 = arith.addf %146, %35 : vector<4x324xf32>
    %c0_74 = arith.constant 0 : index
    %c0_75 = arith.constant 0 : index
    %c0_76 = arith.constant 0 : index
    %148 = vector.load %arg7[%c0_74, %c0_75, %c0_76] : memref<1x4x324xf32, #tpu.memory_space<vmem>>, vector<1x4x324xf32>
    %149 = vector.shape_cast %148 : vector<1x4x324xf32> to vector<4x324xf32>
    %150 = vector.shape_cast %147 : vector<4x324xf32> to vector<1x4x324xf32>
    tpu.vector_store %arg7[%c0_74, %c0_75, %c0_76], %150 {strides = array<i32>} : memref<1x4x324xf32, #tpu.memory_space<vmem>>, vector<1x4x324xf32>,
    return
  }
  func.func @transform_0(%arg0: i32) -> (i32, i32, i32) {
    %c0_i32 = arith.constant 0 : i32
    %c0_i32_0 = arith.constant 0 : i32
    %c0_i32_1 = arith.constant 0 : i32
    return %arg0, %c0_i32, %c0_i32_0 : i32, i32, i32
  }
  func.func @transform_1(%arg0: i32) -> (i32, i32, i32) {
    %c0_i32 = arith.constant 0 : i32
    %c0_i32_0 = arith.constant 0 : i32
    %c0_i32_1 = arith.constant 0 : i32
    %c0_i32_2 = arith.constant 0 : i32
    return %c0_i32, %c0_i32_0, %c0_i32_1 : i32, i32, i32
  }
  func.func @transform_2(%arg0: i32) -> (i32, i32) {
    %c0_i32 = arith.constant 0 : i32
    %c0_i32_0 = arith.constant 0 : i32
    %c0_i32_1 = arith.constant 0 : i32
    return %c0_i32, %c0_i32_0 : i32, i32
  }
  func.func @transform_3(%arg0: i32) -> (i32, i32, i32) {
    %c0_i32 = arith.constant 0 : i32
    %c0_i32_0 = arith.constant 0 : i32
    %c0_i32_1 = arith.constant 0 : i32
    %c0_i32_2 = arith.constant 0 : i32
    return %c0_i32, %c0_i32_0, %c0_i32_1 : i32, i32, i32
  }
  func.func @transform_4(%arg0: i32) -> (i32, i32) {
    %c0_i32 = arith.constant 0 : i32
    %c0_i32_0 = arith.constant 0 : i32
    %c0_i32_1 = arith.constant 0 : i32
    return %c0_i32, %c0_i32_0 : i32, i32
  }
  func.func @transform_5(%arg0: i32) -> (i32, i32) {
    %c0_i32 = arith.constant 0 : i32
    %c0_i32_0 = arith.constant 0 : i32
    %c0_i32_1 = arith.constant 0 : i32
    return %c0_i32, %c0_i32_0 : i32, i32
  }
  func.func @transform_6(%arg0: i32) -> (i32, i32, i32) {
    %c0_i32 = arith.constant 0 : i32
    %c0_i32_0 = arith.constant 0 : i32
    %c0_i32_1 = arith.constant 0 : i32
    return %arg0, %c0_i32, %c0_i32_0 : i32, i32, i32
  }
}

</mosaic_0001>

<bundles_post_ra>
// kernel: tpu_custom_call.1
= control target key start
LH: loop header
LB: loop body
LE: loop exit
PB: predicated region body
PF: predicated region fallthrough
CT: control target
= control target key end

     0   :  { %11 = vsyncpa [#allocation4], 0  ;;  %s3572_s0 = inlined_call_operand.vmem [shape: f32[2,4,362], index: 0, kind: input, shape index: {}]   ;;  %s3573_s1 = inlined_call_operand.vmem [shape: f32[9,2,4], index: 1, kind: input, shape index: {}]   ;;  %s3574_s2 = inlined_call_operand.vmem [shape: f32[2,1], index: 2, kind: input, shape index: {}]   ;;  %s3575_s3 = inlined_call_operand.vmem [shape: f32[9,4,2], index: 3, kind: input, shape index: {}]   ;;  %s3576_s4 = inlined_call_operand.vmem [shape: f32[4,1], index: 4, kind: input, shape index: {}]   ;;  %s3577_s5 = inlined_call_operand.vmem [shape: f32[1,324], index: 5, kind: input, shape index: {}]   ;;  %s3578_s6 = inlined_call_operand.hbm [shape: f32[2,4,324], index: 6, kind: output, shape index: {}]  }
   0x1   :  { %13 = vsyncpa [#allocation4 + $0x1], 0  ;;  %s3074_s21 = smov 0   ;;  %s3076_s22 = smov 0  }
   0x2   :  { %s3078_s23 = smov 0   ;;  %s3080_s24 = smov 0  }
   0x3 LB: > { %s3095_s25 = sadd.s32 4294967295, %s3023_s24   ;;  %s2659_s26 = sadd.s32 4294967294, %s3023_s24   ;;  %s3023_s24 = sphi %s3080_s24, %s3584_s24   ;;  %s3019_s23 = sphi %s3078_s23, %s3583_s23   ;;  %s3015_s22 = sphi %s3076_s22, %s3582_s22   ;;  %s3011_s21 = sphi %s3074_s21, %s3581_s21  }
   0x4   : > { %s3099_s27 = sadd.s32 1, %s3023_s24   ;;  %s157_s28 = sadd.s32 1, %s3019_s23 }
   0x5   : > { %s154_s29 = ssub.s32 %s3023_s24, %s3099_s27  ;;  %p167_p0 = scmp.ne.s32.totalorder %s3019_s23, %s3015_s22 }
   0x6   : > { %p155_p1 = scmp.eq.s32.totalorder %s154_s29, 0  ;;  %p168_p2 = scmp.eq.s32.totalorder %s3095_s25, 1 }
   0x7   : > { %p173_p3 = scmp.ne.s32.totalorder %s3015_s22, %s3011_s21  ;;  %p174_p4 = scmp.eq.s32.totalorder %s2659_s26, 1 }
   0x8   : > { %s3110_s30 = scalar_select %p155_p1, %s3019_s23, %s157_s28  }
   0x9   : > { %p3112_p5 = por %p168_p2, %p167_p0  ;;  %p3116_p6 = por %p174_p4, %p173_p3 }
   0xa   : > { %p2662_p7 = scmp.ge.s32.totalorder %s3023_s24, 1  ;;  %p215_p8 = scmp.lt.s32.totalorder %s3023_s24, 3 }
   0xc   : > { %p216_p9 = pnand %p2662_p7, %p215_p8 }
   0xd   : > { %p245_p10 = scmp.lt.s32.totalorder (!%p216_p9), %s3095_s25, 1  ;;  %v3025_v0 = vmov (!%p216_p9), 0.0   ;;  %vm3026_vm0 = vmmov (!%p216_p9), 0   ;;  %v3027_v1 = vmov (!%p216_p9), 0   ;;  %s3028_s14 = smov (!%p216_p9), 127   ;;  %vm312_vm1 = vcmask (!%p216_p9), 1041408  }
   0xe   : > { %219 = sbr.rel (%p216_p9) target bundleno = 1051 (0x41b), region = 44  ;;  %2763 = vmatprep.subr.bf16.mxu1 (!%p216_p9), %v3025_v0  ;;  %2765 = vmatprep.mubr.msk.bf16.mxu1 (!%p216_p9), %vm3026_vm0, %v3025_v0  ;;  %s3029_s15 = smov (!%p216_p9), 126   ;;  %v1309_v22 = vld [vmem:[%s3574_s2] sm:$0x3] (!%p216_p9)  ;;  %v252_v23 = vld [vmem:[%s3573_s1 + $0x2] sm:$0x3] (!%p216_p9) }
   0xf   : > { %354 = vmatprep.mubr.bf16.mxu0 (!%p216_p9), %v3027_v1  ;;  %2926 = vset.pattern.permute.xlu0 (!%p216_p9), %v3027_v1  ;;  %s3030_s16 = smov (!%p216_p9), 110   ;;  %s3031_s17 = smov (!%p216_p9), 109   ;;  %v261_v27 = vpack.c.bf16 (!%p216_p9), %v252_v23, %v252_v23  ;;  %vm308_vm2 = vcmask (!%p216_p9), 31744   ;;  %vm305_vm3 = vcmask (!%p216_p9), 1039360   ;;  %v251_v34 = vld [vmem:[%s3573_s1] sm:$0x3] (!%p216_p9) }
  0x10   : > { %2927 = vset.pattern.permute.xlu1 (!%p216_p9), %v3027_v1  ;;  %s3032_s18 = smov (!%p216_p9), 108   ;;  %s3033_s19 = smov (!%p216_p9), 92   ;;  %vm513_vm4 = vcmask (!%p216_p9), 1031168   ;;  %v260_v38 = vpack.c.bf16 (!%p216_p9), %v251_v34, %v251_v34  ;;  %v253_v44 = vld [vmem:[%s3573_s1 + $0x4] sm:$0x3] (!%p216_p9)  ;;  %vm629_vm5 = vcmask (!%p216_p9), 900096  }
  0x11   : > { %s3034_s20 = smov (!%p216_p9), 91   ;;  %s3035_s26 = smov (!%p216_p9), 90   ;;  %v262_v48 = vpack.c.bf16 (!%p216_p9), %v253_v44, %v253_v44  ;;  %v254_v53 = vld [vmem:[%s3573_s1 + $0x6] sm:$0x3] (!%p216_p9)  ;;  %vm746_vm6 = vcmask (!%p216_p9), 891904   ;;  %vm862_vm7 = vcmask (!%p216_p9), 883712  }
  0x12   : > { %v263_v57 = vpack.c.bf16 (!%p216_p9), %v254_v53, %v254_v53  ;;  %v255_v62 = vld [vmem:[%s3573_s1 + $0x8] sm:$0x3] (!%p216_p9)  ;;  %vm978_vm8 = vcmask (!%p216_p9), 752640   ;;  %vm1094_vm9 = vcmask (!%p216_p9), 744448   ;;  %vm1210_vm10 = vcmask (!%p216_p9), 736256   ;;  %s3037_s29 = smov (!%p216_p9), 19  }
  0x13   : > { %vm1358_vm11 = vcmask (!%p216_p9), 1043458   ;;  %vm1360_vm12 = vcmask (!%p216_p9), 865284   ;;  %vm1388_vm15 = vcmask (!%p216_p9), 1041560  }
  0x14   : > { %vm1359_vm13 = vmor (!%p216_p9), %vm1358_vm11, %vm312_vm1 }
  0x15   : > { %s246_s9 = scalar_select %p245_p10, %s3095_s25, 1  ;;  %vm1361_vm14 = vmor %vm1360_vm12, %vm1359_vm13  ;;  %vm1385_vm12 = vcmask 154624  }
  0x16   : > { %1362 = vst.msk [vmem:[#allocation2] sm:$0x3f] %vm1361_vm14, %v3025_v0  ;;  %vm1428_vm14 = vcmask 15360  }
  0x17   : > { %s2872_s10 = smul.u32 12, %s246_s9 }
  0x19   : > { %s3133_s13 = scalar_lea.vmem %s3572_s0, %s2872_s10 }
  0x1a   : > { %v289_v2 = vld [vmem:[%s3133_s13 + $0x8] sm:$0xf]  ;;  %v3137_v3 = vld [vmem:[%s3133_s13] sm:$0xff] }
  0x1b   : > { %v295_v4 = vpack.c.bf16 %v289_v2, %v289_v2  ;;  %v3141_v5 = vpack.c.bf16 %v3137_v3, %v3137_v3  ;;  %v3145_v6 = vcombine.high %v3137_v3, %v3137_v3  ;;  %v497_v8 = vld [vmem:[%s3133_s13 + $0x8] sm:$0xf] }
  0x1c   : > { %v503_v9 = vpack.c.bf16 %v497_v8, %v497_v8  ;;  %v613_v10 = vld [vmem:[%s3133_s13 + $0x8] sm:$0xf] }
  0x1d   : > { %303 = vrot.lane.b32.xlu1 %v295_v4, %s3028_s14  ;;  %299 = vrot.lane.b32.xlu0 %v3141_v5, %s3028_s14  ;;  %v3152_v7 = vpack.c.bf16 %v3145_v6, %v3145_v6  ;;  %v619_v11 = vpack.c.bf16 %v613_v10, %v613_v10  ;;  %v3168_v12 = vld [vmem:[%s3133_s13 + $0x8] sm:$0xf]  ;;  %v413_v28 = vsel %vm312_vm1, %v295_v4, 0  ;;  %v407_v35 = vsel %vm312_vm1, %v3141_v5, 0 }
  0x1e   : > { %v736_v13 = vpack.c.bf16 %v3168_v12, %v3168_v12  ;;  %v846_v14 = vld [vmem:[%s3133_s13 + $0x8] sm:$0xf] }
  0x1f   : > { %v852_v15 = vpack.c.bf16 %v846_v14, %v846_v14  ;;  %v962_v16 = vld [vmem:[%s3133_s13 + $0x8] sm:$0xf] }
  0x20   : > { %v968_v17 = vpack.c.bf16 %v962_v16, %v962_v16  ;;  %v1078_v18 = vld [vmem:[%s3133_s13 + $0x8] sm:$0xf] }
  0x21   : > { %301 = vrot.lane.b32.xlu0 %v3152_v7, %s3028_s14  ;;  %507 = vrot.lane.b32.xlu1 %v3141_v5, %s3029_s15  ;;  %v1084_v19 = vpack.c.bf16 %v1078_v18, %v1078_v18  ;;  %v1194_v20 = vld [vmem:[%s3133_s13 + $0x8] sm:$0xf] }
  0x22   : > { %v1200_v21 = vpack.c.bf16 %v1194_v20, %v1194_v20 }
  0x25   : > { %511 = vrot.lane.b32.xlu1 %v503_v9, %s3029_s15  ;;  %509 = vrot.lane.b32.xlu0 %v3152_v7, %s3029_s15 }
  0x29   : > { %623 = vrot.lane.b32.xlu0 %v3141_v5, %s3030_s16  ;;  %625 = vrot.lane.b32.xlu1 %v3152_v7, %s3030_s16 }
  0x2d   : > { %627 = vrot.lane.b32.xlu0 %v619_v11, %s3030_s16  ;;  %740 = vrot.lane.b32.xlu1 %v3141_v5, %s3031_s17  ;;  %v256_v11 = vld [vmem:[%s3573_s1 + $0xa] sm:$0x3] }
  0x2e   : > { %v265_v16 = vpack.c.bf16 %v256_v11, %v256_v11 }
  0x31   : > { %744 = vrot.lane.b32.xlu1 %v736_v13, %s3031_s17  ;;  %742 = vrot.lane.b32.xlu0 %v3152_v7, %s3031_s17 }
  0x35   : > { %856 = vrot.lane.b32.xlu0 %v3141_v5, %s3032_s18  ;;  %858 = vrot.lane.b32.xlu1 %v3152_v7, %s3032_s18 }
  0x39   : > { %860 = vrot.lane.b32.xlu0 %v852_v15, %s3032_s18  ;;  %972 = vrot.lane.b32.xlu1 %v3141_v5, %s3033_s19 }
  0x3d   : > { %976 = vrot.lane.b32.xlu1 %v968_v17, %s3033_s19  ;;  %974 = vrot.lane.b32.xlu0 %v3152_v7, %s3033_s19 }
  0x41   : > { %1088 = vrot.lane.b32.xlu0 %v3141_v5, %s3034_s20  ;;  %1090 = vrot.lane.b32.xlu1 %v3152_v7, %s3034_s20 }
  0x45   : > { %1092 = vrot.lane.b32.xlu0 %v1084_v19, %s3034_s20  ;;  %1204 = vrot.lane.b32.xlu1 %v3141_v5, %s3035_s26  ;;  %v264_v5 = vpack.c.bf16 %v255_v62, %v255_v62 }
  0x49   : > { %1208 = vrot.lane.b32.xlu1 %v1200_v21, %s3035_s26  ;;  %1206 = vrot.lane.b32.xlu0 %v3152_v7, %s3035_s26  ;;  %v257_v21 = vld [vmem:[%s3573_s1 + $0xc] sm:$0x3] }
  0x4d   : > { %1312 = vperm.xlu0 %2926, %v1309_v22  }
  0x8f   : > { %v304_v24 = vpop.permute.xlu1 %303  ;;  %v300_v25 = vpop.permute.xlu0 %299 }
  0x90   : > { %v320_v26 = vsel %vm312_vm1, %v304_v24, 0 }
  0x91   : > { %2764 = vmatpush3.bf16.msra.mxu1 %v320_v26 }
  0x92   : > { %2769 = vmatprep.subr.bf16.mxu1 %v3025_v0 }
  0x93   : > { %v302_v29 = vpop.permute.xlu0 %301  ;;  %v508_v30 = vpop.permute.xlu1 %507 }
  0x94   : > { %2766 = vmatmul.mubr.msk.bf16.vlgmr.msra.gmra.mrb[0].mxu1 %vm308_vm2, %v261_v27  ;;  %v307_v31 = vsel %vm305_vm3, %v302_v29, %v304_v24  ;;  %v306_v32 = vsel %vm305_vm3, %v300_v25, %v302_v29  ;;  %v266_v25 = vpack.c.bf16 %v257_v21, %v257_v21  ;;  %v258_v29 = vld [vmem:[%s3573_s1 + $0xe] sm:$0x3] }
  0x95   : > { %2664 = vmatprep.subr.msk.bf16.mxu0 %vm312_vm1, %v307_v31  ;;  %v314_v33 = vsel %vm312_vm1, %v306_v32, 0  ;;  %2770 = vmatpush3.bf16.msra.mxu1 %v413_v28 }
  0x96   : > { %323 = vmatpush1.bf16.msra.mxu0 %v314_v33  ;;  %2771 = vmatprep.mubr.msk.bf16.mxu1 %vm3026_vm0, %v3025_v0  ;;  %v267_v33 = vpack.c.bf16 %v258_v29, %v258_v29 }
  0x97   : > { %2667 = vmatprep.subr.msk.bf16.mxu0 %vm312_vm1, %v3152_v7  ;;  %v512_v36 = vpop.permute.xlu1 %511  ;;  %v510_v37 = vpop.permute.xlu0 %509  ;;  %2775 = vmatprep.subr.bf16.mxu1 %v3025_v0 }
  0x98   : > { %v515_v39 = vsel %vm513_vm4, %v510_v37, %v512_v36  ;;  %v526_v40 = vsel %vm312_vm1, %v512_v36, 0  ;;  %v514_v43 = vsel %vm513_vm4, %v508_v30, %v510_v37  ;;  %v259_v37 = vld [vmem:[%s3573_s1 + $0x10] sm:$0x3] }
  0x99   : > { %2665 = vmatmul.mubr.msk.bf16.vlgmr.msra.gmra.mrb[0].mxu0 %vm308_vm2, %v261_v27  ;;  %v520_v45 = vsel %vm312_vm1, %v514_v43, 0 }
  0x9a   : > { %416 = vmatpush1.bf16.msra.mxu0 %v407_v35  ;;  %447 = vmatprep.mubr.bf16.mxu0 %v3027_v1 }
  0x9b   : > { %2670 = vmatprep.subr.msk.bf16.mxu0 %vm312_vm1, %v515_v39  ;;  %v624_v41 = vpop.permute.xlu0 %623  ;;  %v626_v42 = vpop.permute.xlu1 %625  ;;  %v268_v39 = vpack.c.bf16 %v259_v37, %v259_v37 }
  0x9c   : > { %2772 = vmatmul.mubr.msk.bf16.vlgmr.msra.gmra.mrb[4].mxu1 %vm308_vm2, %v260_v38  ;;  %v630_v52 = vsel %vm629_vm5, %v624_v41, %v626_v42 }
  0x9d   : > { %2776 = vmatpush3.bf16.msra.mxu1 %v526_v40  ;;  %2777 = vmatprep.mubr.msk.bf16.mxu1 %vm3026_vm0, %v3025_v0  ;;  %v636_v55 = vsel %vm312_vm1, %v630_v52, 0 }
  0x9e   : > { %2781 = vmatprep.subr.bf16.mxu1 %v3025_v0 }
  0x9f   : > { %v628_v46 = vpop.permute.xlu0 %627  ;;  %v741_v47 = vpop.permute.xlu1 %740 }
  0xa0   : > { %v631_v49 = vsel %vm629_vm5, %v626_v42, %v628_v46  ;;  %v642_v50 = vsel %vm312_vm1, %v628_v46, 0 }
  0xa1   : > { %2668 = vmatmul.mubr.msk.bf16.vlgmr.msra.gmra.mrb[4].mxu0 %vm308_vm2, %v260_v38 }
  0xa2   : > { %529 = vmatpush1.bf16.msra.mxu0 %v520_v45  ;;  %560 = vmatprep.mubr.bf16.mxu0 %v3027_v1 }
  0xa3   : > { %2673 = vmatprep.subr.msk.bf16.mxu0 %vm312_vm1, %v631_v49  ;;  %v743_v51 = vpop.permute.xlu0 %742  ;;  %v745_v54 = vpop.permute.xlu1 %744 }
  0xa4   : > { %2778 = vmatmul.mubr.msk.bf16.vlgmr.msra.gmra.mrb[8].mxu1 %vm308_vm2, %v262_v48  ;;  %v748_v58 = vsel %vm746_vm6, %v743_v51, %v745_v54  ;;  %v759_v60 = vsel %vm312_vm1, %v745_v54, 0  ;;  %v747_v61 = vsel %vm746_vm6, %v741_v47, %v743_v51 }
  0xa5   : > { %2782 = vmatpush3.bf16.msra.mxu1 %v642_v50  ;;  %2783 = vmatprep.mubr.msk.bf16.mxu1 %vm3026_vm0, %v3025_v0  ;;  %v753_v2 = vsel %vm312_vm1, %v747_v61, 0 }
  0xa6   : > { %2787 = vmatprep.subr.bf16.mxu1 %v3025_v0 }
  0xa7   : > { %v857_v56 = vpop.permute.xlu0 %856  ;;  %v859_v59 = vpop.permute.xlu1 %858 }
  0xa8   : > { %v863_v10 = vsel %vm862_vm7, %v857_v56, %v859_v59 }
  0xa9   : > { %2671 = vmatmul.mubr.msk.bf16.vlgmr.msra.gmra.mrb[8].mxu0 %vm308_vm2, %v262_v48  ;;  %v869_v14 = vsel %vm312_vm1, %v863_v10, 0 }
  0xaa   : > { %645 = vmatpush1.bf16.msra.mxu0 %v636_v55  ;;  %676 = vmatprep.mubr.bf16.mxu0 %v3027_v1 }
  0xab   : > { %2676 = vmatprep.subr.msk.bf16.mxu0 %vm312_vm1, %v748_v58  ;;  %v861_v63 = vpop.permute.xlu0 %860  ;;  %v973_v4 = vpop.permute.xlu1 %972 }
  0xac   : > { %2784 = vmatmul.mubr.msk.bf16.vlgmr.msra.gmra.mrb[12].mxu1 %vm308_vm2, %v263_v57  ;;  %v864_v7 = vsel %vm862_vm7, %v859_v59, %v861_v63  ;;  %v875_v9 = vsel %vm312_vm1, %v861_v63, 0 }
  0xad   : > { %2788 = vmatpush3.bf16.msra.mxu1 %v759_v60  ;;  %2789 = vmatprep.mubr.msk.bf16.mxu1 %vm3026_vm0, %v3025_v0 }
  0xae   : > { %2793 = vmatprep.subr.bf16.mxu1 %v3025_v0 }
  0xaf   : > { %v975_v8 = vpop.permute.xlu0 %974  ;;  %v977_v13 = vpop.permute.xlu1 %976 }
  0xb0   : > { %v980_v17 = vsel %vm978_vm8, %v975_v8, %v977_v13  ;;  %v991_v19 = vsel %vm312_vm1, %v977_v13, 0  ;;  %v979_v20 = vsel %vm978_vm8, %v973_v4, %v975_v8 }
  0xb1   : > { %2674 = vmatmul.mubr.msk.bf16.vlgmr.msra.gmra.mrb[12].mxu0 %vm308_vm2, %v263_v57  ;;  %v985_v23 = vsel %vm312_vm1, %v979_v20, 0 }
  0xb2   : > { %762 = vmatpush1.bf16.msra.mxu0 %v753_v2  ;;  %793 = vmatprep.mubr.bf16.mxu0 %v3027_v1 }
  0xb3   : > { %2679 = vmatprep.subr.msk.bf16.mxu0 %vm312_vm1, %v864_v7  ;;  %v1089_v15 = vpop.permute.xlu0 %1088  ;;  %v1091_v18 = vpop.permute.xlu1 %1090 }
  0xb4   : > { %2790 = vmatmul.mubr.msk.bf16.vlgmr.msra.gmra.mrb[16].mxu1 %vm308_vm2, %v264_v5  ;;  %v1095_v28 = vsel %vm1094_vm9, %v1089_v15, %v1091_v18 }
  0xb5   : > { %2794 = vmatpush3.bf16.msra.mxu1 %v875_v9  ;;  %2795 = vmatprep.mubr.msk.bf16.mxu1 %vm3026_vm0, %v3025_v0  ;;  %v1101_v32 = vsel %vm312_vm1, %v1095_v28, 0 }
  0xb6   : > { %2799 = vmatprep.subr.bf16.mxu1 %v3025_v0 }
  0xb7   : > { %v1093_v22 = vpop.permute.xlu0 %1092  ;;  %v1205_v24 = vpop.permute.xlu1 %1204 }
  0xb8   : > { %v1096_v26 = vsel %vm1094_vm9, %v1091_v18, %v1093_v22  ;;  %v1107_v27 = vsel %vm312_vm1, %v1093_v22, 0 }
  0xb9   : > { %2677 = vmatmul.mubr.msk.bf16.vlgmr.msra.gmra.mrb[16].mxu0 %vm308_vm2, %v264_v5 }
  0xba   : > { %878 = vmatpush1.bf16.msra.mxu0 %v869_v14  ;;  %909 = vmatprep.mubr.bf16.mxu0 %v3027_v1 }
  0xbb   : > { %2682 = vmatprep.subr.msk.bf16.mxu0 %vm312_vm1, %v980_v17  ;;  %v1209_v30 = vpop.permute.xlu1 %1208  ;;  %v1207_v31 = vpop.permute.xlu0 %1206 }
  0xbc   : > { %2796 = vmatmul.mubr.msk.bf16.vlgmr.msra.gmra.mrb[20].mxu1 %vm308_vm2, %v265_v16  ;;  %v1212_v34 = vsel %vm1210_vm10, %v1207_v31, %v1209_v30  ;;  %v1223_v35 = vsel %vm312_vm1, %v1209_v30, 0  ;;  %v1211_v36 = vsel %vm1210_vm10, %v1205_v24, %v1207_v31 }
  0xbd   : > { %2800 = vmatpush3.bf16.msra.mxu1 %v991_v19  ;;  %2801 = vmatprep.mubr.msk.bf16.mxu1 %vm3026_vm0, %v3025_v0  ;;  %v1217_v38 = vsel %vm312_vm1, %v1211_v36, 0 }
  0xbe   : > { %2805 = vmatprep.subr.bf16.mxu1 %v3025_v0 }
  0xc1   : > { %2680 = vmatmul.mubr.msk.bf16.vlgmr.msra.gmra.mrb[20].mxu0 %vm308_vm2, %v265_v16 }
  0xc2   : > { %994 = vmatpush1.bf16.msra.mxu0 %v985_v23  ;;  %1025 = vmatprep.mubr.bf16.mxu0 %v3027_v1 }
  0xc3   : > { %2685 = vmatprep.subr.msk.bf16.mxu0 %vm312_vm1, %v1096_v26 }
  0xc4   : > { %2802 = vmatmul.mubr.msk.bf16.vlgmr.msra.gmra.mrb[24].mxu1 %vm308_vm2, %v266_v25 }
  0xc5   : > { %2806 = vmatpush3.bf16.msra.mxu1 %v1107_v27  ;;  %2807 = vmatprep.mubr.msk.bf16.mxu1 %vm3026_vm0, %v3025_v0 }
  0xc6   : > { %2811 = vmatprep.subr.bf16.mxu1 %v3025_v0 }
  0xc9   : > { %2683 = vmatmul.mubr.msk.bf16.vlgmr.msra.gmra.mrb[24].mxu0 %vm308_vm2, %v266_v25 }
  0xca   : > { %1110 = vmatpush1.bf16.msra.mxu0 %v1101_v32  ;;  %1141 = vmatprep.mubr.bf16.mxu0 %v3027_v1 }
  0xcb   : > { %2688 = vmatprep.subr.msk.bf16.mxu0 %vm312_vm1, %v1212_v34  ;;  %vm1389_vm1 = vmor %vm1358_vm11, %vm1388_vm15  ;;  %vm1432_vm11 = vcmask 1040384  }
  0xcc   : > { %2808 = vmatmul.mubr.msk.bf16.vlgmr.msra.gmra.mrb[28].mxu1 %vm308_vm2, %v267_v33 }
  0xcd   : > { %2812 = vmatpush3.bf16.msra.mxu1 %v1223_v35  ;;  %2813 = vmatprep.mubr.msk.bf16.mxu1 %vm3026_vm0, %v3025_v0 }
  0xce   : > { %2817 = vmatprep.subr.bf16.mxu1 %v3025_v0 }
  0xd1   : > { %2686 = vmatmul.mubr.msk.bf16.vlgmr.msra.gmra.mrb[28].mxu0 %vm308_vm2, %v267_v33 }
  0xd2   : > { %1226 = vmatpush1.bf16.msra.mxu0 %v1217_v38  ;;  %1257 = vmatprep.mubr.bf16.mxu0 %v3027_v1 }
  0xd4   : > { %2814 = vmatmul.mubr.msk.bf16.vlgmr.msra.gmra.mrb[32].mxu1 %vm308_vm2, %v268_v39 }
  0xd5   : > { %2819 = vmatprep.mubr.msk.bf16.mxu1 %vm3026_vm0, %v3025_v0 }
  0xd9   : > { %2689 = vmatmul.mubr.msk.bf16.vlgmr.msra.gmra.mrb[32].mxu0 %vm308_vm2, %v268_v39  ;;  %vm1390_vm2 = vcmask 709636  }
  0xda   : > { %1474 = vmatprep.mubr.bf16.mxu0 %v3027_v1  ;;  %vm1391_vm13 = vmor %vm1390_vm2, %vm1389_vm1 }
 0x167   : > { %v397_v40 = vpop.f32.mrb[0].mxu1 }
 0x168   : > { %v2767_v41 = vpop.f32.mrb[1].mxu1 }
 0x169   : > { %v400_v42 = vpop.f32.mrb[2].mxu1 }
 0x16a   : > { %v2768_v43 = vpop.f32.mrb[3].mxu1 }
 0x16c   : > { %v356_v44 = vpop.f32.mrb[0].mxu0 }
 0x16d   : > { %v358_v45 = vpop.f32.mrb[1].mxu0 }
 0x16e   : > { %v360_v46 = vpop.f32.mrb[2].mxu0 }
 0x16f   : > { %v361_v47 = vpop.f32.mrb[3].mxu0  ;;  %v490_v48 = vpop.f32.mrb[4].mxu1 }
 0x170   : > { %v491_v49 = vadd.f32 %v490_v48, %v397_v40  ;;  %v2773_v50 = vpop.f32.mrb[5].mxu1 }
 0x171   : > { %v493_v51 = vpop.f32.mrb[6].mxu1 }
 0x172   : > { %v2774_v52 = vpop.f32.mrb[7].mxu1 }
 0x174   : > { %v449_v53 = vpop.f32.mrb[4].mxu0 }
 0x175   : > { %v450_v54 = vadd.f32 %v449_v53, %v356_v44  ;;  %v451_v55 = vpop.f32.mrb[5].mxu0 }
 0x176   : > { %v452_v56 = vadd.f32 %v451_v55, %v358_v45  ;;  %v453_v57 = vpop.f32.mrb[6].mxu0 }
 0x177   : > { %v454_v58 = vpop.f32.mrb[7].mxu0  ;;  %v603_v59 = vpop.f32.mrb[8].mxu1 }
 0x178   : > { %v611_v60 = vadd.f32 %v603_v59, %v491_v49  ;;  %v2779_v61 = vpop.f32.mrb[9].mxu1 }
 0x179   : > { %v606_v62 = vpop.f32.mrb[10].mxu1 }
 0x17a   : > { %v2780_v63 = vpop.f32.mrb[11].mxu1 }
 0x17c   : > { %v562_v2 = vpop.f32.mrb[8].mxu0 }
 0x17d   : > { %v609_v4 = vadd.f32 %v562_v2, %v450_v54  ;;  %v564_v5 = vpop.f32.mrb[9].mxu0 }
 0x17e   : > { %v610_v7 = vadd.f32 %v564_v5, %v452_v56  ;;  %v566_v8 = vpop.f32.mrb[10].mxu0 }
 0x17f   : > { %v567_v9 = vpop.f32.mrb[11].mxu0  ;;  %v719_v10 = vpop.f32.mrb[12].mxu1 }
 0x180   : > { %v727_v11 = vadd.f32 %v719_v10, %v611_v60  ;;  %v2785_v13 = vpop.f32.mrb[13].mxu1 }
 0x181   : > { %v722_v14 = vpop.f32.mrb[14].mxu1 }
 0x182   : > { %v2786_v15 = vpop.f32.mrb[15].mxu1 }
 0x184   : > { %v678_v16 = vpop.f32.mrb[12].mxu0 }
 0x185   : > { %v725_v17 = vadd.f32 %v678_v16, %v609_v4  ;;  %v680_v18 = vpop.f32.mrb[13].mxu0  ;;  %v1313_v4 = vpop.permute.xlu0 %1312 }
 0x186   : > { %v726_v19 = vadd.f32 %v680_v18, %v610_v7  ;;  %v682_v20 = vpop.f32.mrb[14].mxu0 }
 0x187   : > { %v683_v21 = vpop.f32.mrb[15].mxu0  ;;  %v836_v22 = vpop.f32.mrb[16].mxu1 }
 0x188   : > { %v844_v23 = vadd.f32 %v836_v22, %v727_v11  ;;  %v2791_v24 = vpop.f32.mrb[17].mxu1 }
 0x189   : > { %v839_v25 = vpop.f32.mrb[18].mxu1 }
 0x18a   : > { %v2792_v26 = vpop.f32.mrb[19].mxu1 }
 0x18c   : > { %v795_v27 = vpop.f32.mrb[16].mxu0 }
 0x18d   : > { %v842_v28 = vadd.f32 %v795_v27, %v725_v17  ;;  %v797_v29 = vpop.f32.mrb[17].mxu0 }
 0x18e   : > { %v843_v30 = vadd.f32 %v797_v29, %v726_v19  ;;  %v799_v31 = vpop.f32.mrb[18].mxu0  ;;  %v1340_v29 = vlaneseq }
 0x18f   : > { %v800_v32 = vpop.f32.mrb[19].mxu0  ;;  %v952_v33 = vpop.f32.mrb[20].mxu1 }
 0x190   : > { %v960_v34 = vadd.f32 %v952_v33, %v844_v23  ;;  %v2797_v35 = vpop.f32.mrb[21].mxu1  ;;  %v1341_v32 = vshrl.u32 %v1340_v29, 7 }
 0x191   : > { %v955_v36 = vpop.f32.mrb[22].mxu1  ;;  %v3036_v35 = vmov 1983009808  }
 0x192   : > { %v2798_v37 = vpop.f32.mrb[23].mxu1  ;;  %v1342_v33 = vsub.s32 0, %v1341_v32  ;;  %v1368_v36 = vunpack.c.l.s4 %v3036_v35 }
 0x193   : > { %v1346_v37 = vsub.s32 1, %v1341_v32 }
 0x194   : > { %v911_v38 = vpop.f32.mrb[20].mxu0 }
 0x195   : > { %v958_v39 = vadd.f32 %v911_v38, %v842_v28  ;;  %v913_v40 = vpop.f32.mrb[21].mxu0 }
 0x196   : > { %v959_v41 = vadd.f32 %v913_v40, %v843_v30  ;;  %v915_v42 = vpop.f32.mrb[22].mxu0 }
 0x197   : > { %v916_v43 = vpop.f32.mrb[23].mxu0  ;;  %v1068_v44 = vpop.f32.mrb[24].mxu1 }
 0x198   : > { %v1076_v45 = vadd.f32 %v1068_v44, %v960_v34  ;;  %v2803_v46 = vpop.f32.mrb[25].mxu1  ;;  %v1350_v34 = vsub.s32 2, %v1341_v32  ;;  %v1369_v43 = vunpack.c.0.s8 %v1368_v36 }
 0x199   : > { %v1071_v47 = vpop.f32.mrb[26].mxu1 }
 0x19a   : > { %v2804_v48 = vpop.f32.mrb[27].mxu1 }
 0x19c   : > { %v1027_v49 = vpop.f32.mrb[24].mxu0 }
 0x19d   : > { %v1074_v50 = vadd.f32 %v1027_v49, %v958_v39  ;;  %v1029_v51 = vpop.f32.mrb[25].mxu0  ;;  %v287_v39 = vld [vmem:[%s3577_s5] sm:$0x7] }
 0x19e   : > { %v1075_v52 = vadd.f32 %v1029_v51, %v959_v41  ;;  %v1031_v53 = vpop.f32.mrb[26].mxu0  ;;  %v1343_v40 = vrot.slane %v287_v39, %v1342_v33  ;;  %v1351_v42 = vrot.slane %v287_v39, %v1350_v34 }
 0x19f   : > { %v1032_v54 = vpop.f32.mrb[27].mxu0  ;;  %v1184_v55 = vpop.f32.mrb[28].mxu1 }
 0x1a0   : > { %v1192_v56 = vadd.f32 %v1184_v55, %v1076_v45  ;;  %v2809_v57 = vpop.f32.mrb[29].mxu1  ;;  %v1347_v45 = vrot.slane %v287_v39, %v1346_v37 }
 0x1a1   : > { %v1187_v58 = vpop.f32.mrb[30].mxu1 }
 0x1a2   : > { %v2810_v59 = vpop.f32.mrb[31].mxu1 }
 0x1a4   : > { %v1143_v60 = vpop.f32.mrb[28].mxu0 }
 0x1a5   : > { %v1190_v61 = vadd.f32 %v1143_v60, %v1074_v50  ;;  %v1145_v62 = vpop.f32.mrb[29].mxu0  ;;  %v3337_v50 = vsub.s32 %v1369_v43, %v1341_v32 }
 0x1a6   : > { %v1191_v63 = vadd.f32 %v1145_v62, %v1075_v52  ;;  %v1147_v2 = vpop.f32.mrb[30].mxu0 }
 0x1a7   : > { %v1148_v5 = vpop.f32.mrb[31].mxu0  ;;  %v1300_v7 = vpop.f32.mrb[32].mxu1 }
 0x1a8   : > { %v1308_v8 = vadd.f32 %v1300_v7, %v1192_v56  ;;  %v2815_v9 = vpop.f32.mrb[33].mxu1 }
 0x1a9   : > { %v1303_v10 = vpop.f32.mrb[34].mxu1 }
 0x1aa   : > { %v1317_v11 = vadd.f32 %v1313_v4, %v1308_v8  ;;  %v2816_v13 = vpop.f32.mrb[35].mxu1 }
 0x1ac   : > { %v2693_v14 = vmul.f32 -1.442695, %v1317_v11  ;;  %v1259_v15 = vpop.f32.mrb[32].mxu0 }
 0x1ad   : > { %v1306_v16 = vadd.f32 %v1259_v15, %v1190_v61  ;;  %v1261_v17 = vpop.f32.mrb[33].mxu0 }
 0x1ae   : > { %2937 = vpow2.f32 %v2693_v14  ;;  %v1307_v18 = vadd.f32 %v1261_v17, %v1191_v63  ;;  %v1263_v19 = vpop.f32.mrb[34].mxu0 }
 0x1af   : > { %v1315_v20 = vadd.f32 %v1313_v4, %v1306_v16  ;;  %v1264_v21 = vpop.f32.mrb[35].mxu0 }
 0x1b0   : > { %v1316_v22 = vadd.f32 %v1313_v4, %v1307_v18 }
 0x1b1   : > { %v2691_v23 = vmul.f32 -1.442695, %v1315_v20 }
 0x1b2   : > { %v2692_v24 = vmul.f32 -1.442695, %v1316_v22 }
 0x1b3   : > { %2939 = vpow2.f32 %v2691_v23 }
 0x1b4   : > { %2941 = vpow2.f32 %v2692_v24 }
 0x1b8   : > { %v2938_v25 = vpop.eup %2937 }
 0x1b9   : > { %v1329_v26 = vadd.f32 1.0, %v2938_v25 }
 0x1bb   : > { %2943 = vrcp.f32 %v1329_v26 }
 0x1bd   : > { %v2940_v27 = vpop.eup %2939 }
 0x1be   : > { %v2942_v28 = vpop.eup %2941  ;;  %v1327_v30 = vadd.f32 1.0, %v2940_v27 }
 0x1bf   : > { %v1328_v31 = vadd.f32 1.0, %v2942_v28 }
 0x1c0   : > { %2945 = vrcp.f32 %v1327_v30 }
 0x1c1   : > { %2947 = vrcp.f32 %v1328_v31 }
 0x1c5   : > { %v2944_v38 = vpop.eup %2943 }
 0x1c6   : > { %v1338_v44 = vmul.f32 %v2944_v38, %v1317_v11 }
 0x1c8   : > { %v1357_v51 = vmul.f32 %v1351_v42, %v1338_v44 }
 0x1ca   : > { %v2946_v41 = vpop.eup %2945  ;;  %v1380_v55 = vrot.slane %v1357_v51, %v3337_v50 }
 0x1cb   : > { %v2948_v46 = vpop.eup %2947  ;;  %v1336_v47 = vmul.f32 %v2946_v41, %v1315_v20 }
 0x1cc   : > { %v1337_v48 = vmul.f32 %v2948_v46, %v1316_v22 }
 0x1cd   : > { %v1355_v49 = vmul.f32 %v1343_v40, %v1336_v47 }
 0x1ce   : > { %v1356_v52 = vmul.f32 %v1347_v45, %v1337_v48 }
 0x1d0   : > { %v1366_v53 = vcombine.low %v1355_v49, %v1356_v52 }
 0x1d2   : > { %v1373_v54 = vrot.slane %v1366_v53, %v3337_v50 }
 0x1d4   : > { %v1381_v56 = vcombine.low %v1373_v54, %v1380_v55 }
 0x1d6   : > { %1382 = vrot.lane.b32.xlu1 %v1381_v56, %s3037_s29 }
 0x248   : > { %v1383_v57 = vpop.permute.xlu1 %1382 }
 0x249   : > { %v1384_v58 = vrot.slane %v1383_v57, 6 }
 0x24b   : > { %v1386_v59 = vsel %vm1385_vm12, %v1384_v58, %v1383_v57 }
 0x24c   : > { %1392 = vst.msk [vmem:[#allocation2] sm:$0x3f] %vm1391_vm13, %v1386_v59 }
 0x253   : > { %v1393_v60 = vld [vmem:[#allocation2] sm:$0x3f] }
 0x254   : > { %v1616_v61 = vld [vmem:[#allocation2] sm:$0x3f]  ;;  %v1402_v62 = vrot.slane %v1393_v60, %v3337_v50  ;;  %v1395_v63 = vcombine.high %v1393_v60, %v1393_v60 }
 0x255   : > { %v1625_v7 = vrot.slane %v1616_v61, %v3337_v50  ;;  %v1618_v9 = vcombine.high %v1616_v61, %v1616_v61  ;;  %v1747_v10 = vld [vmem:[#allocation2] sm:$0x3f] }
 0x256   : > { %v3343_v2 = vpack.c.bf16 %v1402_v62, %v1402_v62  ;;  %v1410_v4 = vcombine.high %v1402_v62, %v1402_v62  ;;  %v1409_v5 = vrot.slane %v1395_v63, %v3337_v50  ;;  %v1756_v16 = vrot.slane %v1747_v10, %v3337_v50  ;;  %v1878_v19 = vld [vmem:[#allocation2] sm:$0x3f] }
 0x257   : > { %v1633_v13 = vcombine.high %v1625_v7, %v1625_v7  ;;  %v1637_v14 = vpack.c.bf16 %v1625_v7, %v1625_v7  ;;  %v1632_v15 = vrot.slane %v1618_v9, %v3337_v50  ;;  %v1749_v18 = vcombine.high %v1747_v10, %v1747_v10  ;;  %v2009_v27 = vld [vmem:[#allocation2] sm:$0x3f] }
 0x258   : > { %1420 = vrot.lane.b32.xlu1 %v3343_v2, %s3028_s14  ;;  %v3349_v8 = vpack.c.bf16 %v1410_v4, %v1410_v4  ;;  %v3353_v11 = vpack.c.bf16 %v1409_v5, %v1409_v5  ;;  %v1764_v21 = vcombine.high %v1756_v16, %v1756_v16  ;;  %v1768_v22 = vpack.c.bf16 %v1756_v16, %v1756_v16  ;;  %v2140_v35 = vld [vmem:[#allocation2] sm:$0x3f] }
 0x259   : > { %v1638_v17 = vpack.c.bf16 %v1633_v13, %v1633_v13  ;;  %v1639_v20 = vpack.c.bf16 %v1632_v15, %v1632_v15  ;;  %v1763_v23 = vrot.slane %v1749_v18, %v3337_v50  ;;  %v1887_v24 = vrot.slane %v1878_v19, %v3337_v50  ;;  %v2271_v43 = vld [vmem:[#allocation2] sm:$0x3f] }
 0x25a   : > { %1422 = vrot.lane.b32.xlu0 %v3349_v8, %s3028_s14  ;;  %v1769_v25 = vpack.c.bf16 %v1764_v21, %v1764_v21  ;;  %v1880_v26 = vcombine.high %v1878_v19, %v1878_v19  ;;  %v2018_v32 = vrot.slane %v2009_v27, %v3337_v50  ;;  %v2011_v34 = vcombine.high %v2009_v27, %v2009_v27  ;;  %v2402_v52 = vld [vmem:[#allocation2] sm:$0x3f] }
 0x25b   : > { %v1770_v28 = vpack.c.bf16 %v1763_v23, %v1763_v23  ;;  %v1895_v29 = vcombine.high %v1887_v24, %v1887_v24  ;;  %v1899_v30 = vpack.c.bf16 %v1887_v24, %v1887_v24  ;;  %v2149_v40 = vrot.slane %v2140_v35, %v3337_v50  ;;  %v2533_v7 = vld [vmem:[%s3576_s4] sm:$0xf]  ;;  %v270_v10 = vld [vmem:[%s3575_s3 + $0x4] sm:$0xf] }
 0x25c   : > { %1424 = vrot.lane.b32.xlu1 %v3353_v11, %s3028_s14  ;;  %v1894_v31 = vrot.slane %v1880_v26, %v3337_v50  ;;  %v2026_v37 = vcombine.high %v2018_v32, %v2018_v32  ;;  %v2030_v38 = vpack.c.bf16 %v2018_v32, %v2018_v32  ;;  %v2025_v39 = vrot.slane %v2011_v34, %v3337_v50  ;;  %v269_v21 = vld [vmem:[%s3575_s3] sm:$0xf] }
 0x25d   : > { %v1900_v33 = vpack.c.bf16 %v1895_v29, %v1895_v29  ;;  %v2142_v42 = vcombine.high %v2140_v35, %v2140_v35  ;;  %v2157_v45 = vcombine.high %v2149_v40, %v2149_v40  ;;  %v2161_v46 = vpack.c.bf16 %v2149_v40, %v2149_v40  ;;  %v271_v29 = vld [vmem:[%s3575_s3 + $0x8] sm:$0xf] }
 0x25e   : > { %1643 = vrot.lane.b32.xlu0 %v1637_v14, %s3029_s15  ;;  %v1901_v36 = vpack.c.bf16 %v1894_v31, %v1894_v31  ;;  %v2031_v41 = vpack.c.bf16 %v2026_v37, %v2026_v37  ;;  %v2032_v44 = vpack.c.bf16 %v2025_v39, %v2025_v39  ;;  %v2280_v48 = vrot.slane %v2271_v43, %v3337_v50 }
 0x25f   : > { %v2156_v47 = vrot.slane %v2142_v42, %v3337_v50  ;;  %v2162_v49 = vpack.c.bf16 %v2157_v45, %v2157_v45  ;;  %v2273_v51 = vcombine.high %v2271_v43, %v2271_v43  ;;  %v2411_v57 = vrot.slane %v2402_v52, %v3337_v50 }
 0x260   : > { %1645 = vrot.lane.b32.xlu1 %v1638_v17, %s3029_s15  ;;  %v2288_v54 = vcombine.high %v2280_v48, %v2280_v48  ;;  %v2292_v55 = vpack.c.bf16 %v2280_v48, %v2280_v48  ;;  %v2404_v59 = vcombine.high %v2402_v52, %v2402_v52  ;;  %v279_v15 = vpack.c.bf16 %v270_v10, %v270_v10 }
 0x261   : > { %v2163_v53 = vpack.c.bf16 %v2156_v47, %v2156_v47  ;;  %v2287_v56 = vrot.slane %v2273_v51, %v3337_v50  ;;  %v2419_v61 = vcombine.high %v2411_v57, %v2411_v57  ;;  %v2423_v62 = vpack.c.bf16 %v2411_v57, %v2411_v57 }
 0x262   : > { %1647 = vrot.lane.b32.xlu0 %v1639_v20, %s3029_s15  ;;  %v2293_v58 = vpack.c.bf16 %v2288_v54, %v2288_v54  ;;  %v2418_v63 = vrot.slane %v2404_v59, %v3337_v50  ;;  %v1533_v18 = vsel %vm1432_vm11, %v3353_v11, 0  ;;  %v1527_v20 = vsel %vm1432_vm11, %v3343_v2, 0 }
 0x263   : > { %v2294_v60 = vpack.c.bf16 %v2287_v56, %v2287_v56  ;;  %v2424_v4 = vpack.c.bf16 %v2419_v61, %v2419_v61  ;;  %v278_v11 = vpack.c.bf16 %v269_v21, %v269_v21  ;;  %v280_v31 = vpack.c.bf16 %v271_v29, %v271_v29  ;;  %v274_v56 = vld [vmem:[%s3575_s3 + $0x14] sm:$0xf] }
 0x264   : > { %1774 = vrot.lane.b32.xlu1 %v1768_v22, %s3030_s16  ;;  %v2425_v5 = vpack.c.bf16 %v2418_v63, %v2418_v63  ;;  %v283_v59 = vpack.c.bf16 %v274_v56, %v274_v56 }
 0x266   : > { %1776 = vrot.lane.b32.xlu0 %v1769_v25, %s3030_s16 }
 0x268   : > { %1778 = vrot.lane.b32.xlu1 %v1770_v28, %s3030_s16 }
 0x26a   : > { %1905 = vrot.lane.b32.xlu0 %v1899_v30, %s3031_s17 }
 0x26c   : > { %1907 = vrot.lane.b32.xlu1 %v1900_v33, %s3031_s17 }
 0x26e   : > { %1909 = vrot.lane.b32.xlu0 %v1901_v36, %s3031_s17 }
 0x270   : > { %2036 = vrot.lane.b32.xlu1 %v2030_v38, %s3032_s18  ;;  %v272_v38 = vld [vmem:[%s3575_s3 + $0xc] sm:$0xf] }
 0x271   : > { %v281_v40 = vpack.c.bf16 %v272_v38, %v272_v38 }
 0x272   : > { %2038 = vrot.lane.b32.xlu0 %v2031_v41, %s3032_s18 }
 0x274   : > { %2040 = vrot.lane.b32.xlu1 %v2032_v44, %s3032_s18 }
 0x276   : > { %2167 = vrot.lane.b32.xlu0 %v2161_v46, %s3033_s19  ;;  %v273_v46 = vld [vmem:[%s3575_s3 + $0x10] sm:$0xf] }
 0x278   : > { %2169 = vrot.lane.b32.xlu1 %v2162_v49, %s3033_s19  ;;  %v282_v49 = vpack.c.bf16 %v273_v46, %v273_v46 }
 0x27a   : > { %2171 = vrot.lane.b32.xlu0 %v2163_v53, %s3033_s19  ;;  %s242_s19 = sand.u32 1, %s3015_s22  }
 0x27b   : > { %s2586_s28 = scalar_lea.sflag [#allocation4], %s242_s19 }
 0x27c   : > { %2298 = vrot.lane.b32.xlu1 %v2292_v55, %s3034_s20 }
 0x27e   : > { %2300 = vrot.lane.b32.xlu0 %v2293_v58, %s3034_s20 }
 0x280   : > { %2302 = vrot.lane.b32.xlu1 %v2294_v60, %s3034_s20  ;;  %s2871_s20 = smul.u32 12, %s242_s19 }
 0x282   : > { %2429 = vrot.lane.b32.xlu0 %v2423_v62, %s3035_s26  ;;  %s244_s9 = scalar_lea.vmem [#allocation3], %s2871_s20 }
 0x283   : > { %s2600_s10 = sshll.u32 %s244_s9, 4  ;;  %s3532_s10 = int_to_ptr.vmem [resolvable:$true] %s2600_s10 }
 0x284   : > { %2431 = vrot.lane.b32.xlu1 %v2424_v4, %s3035_s26  ;;  %s2961_s29 = scalar_lea.vmem %s3532_s10, 192 }
 0x285   : > { %p2962_p11 = scmp.ne.s32.totalorder %s3532_s10, %s2961_s29 }
 0x286   : > { %2433 = vrot.lane.b32.xlu0 %v2425_v5, %s3035_s26  ;;  %v275_v5 = vld [vmem:[%s3575_s3 + $0x18] sm:$0xf]  ;;  %s2873_s26 = smul.u32 192, %s3095_s25  ;;  %s3038_s25 = smov [#allocation3]  }
 0x287   : > { %p2963_p12 = pnand %p2962_p11, %p3112_p5  ;;  %s2965_s14 = sshll.u32 %s3038_s25, 4  ;;  %s2966_s14 = int_to_ptr.vmem [resolvable:$false] %s2965_s14 }
 0x288   : > { %2536 = vperm.xlu1 %2927, %v2533_v7   ;;  %s3530_s13 = scalar_lea.hbm %s3578_s6, %s2873_s26  ;;  %s2967_s15 = scalar_lea.vmem %s2966_s14, 384 }
 0x289   : > { %p2964_p13 = pneg %p2963_p12  ;;  %p2968_p0 = scmp.lt.s32.totalorder %s3532_s10, %s2966_s14 }
 0x28a   : > { %2563 = vrot.lane.b32.xlu0 %v3137_v3, %s3031_s17  ;;  %p2969_p1 = scmp.lt.s32.totalorder %s2967_s15, %s2961_s29 }
 0x28c   : > { %2565 = vrot.lane.b32.xlu1 %v3145_v6, %s3031_s17  ;;  %p2970_p2 = por %p2969_p1, %p2968_p0 }
 0x28e   : > { %2567 = vrot.lane.b32.xlu0 %v3168_v12, %s3031_s17  ;;  %p2971_p3 = pnand %p2970_p2, %p2964_p13 }
 0x2ca   : > { %v1421_v50 = vpop.permute.xlu1 %1420 }
 0x2cc   : > { %v1423_v9 = vpop.permute.xlu0 %1422 }
 0x2cd   : > { %v1426_v13 = vsel %vm305_vm3, %v1421_v50, %v1423_v9  ;;  %v284_v50 = vpack.c.bf16 %v275_v5, %v275_v5 }
 0x2ce   : > { %v1425_v3 = vpop.permute.xlu1 %1424  ;;  %v1434_v16 = vsel %vm1432_vm11, %v1426_v13, 0 }
 0x2cf   : > { %v1427_v12 = vsel %vm305_vm3, %v1423_v9, %v1425_v3  ;;  %v1440_v14 = vsel %vm1432_vm11, %v1425_v3, 0 }
 0x2d0   : > { %v1644_v17 = vpop.permute.xlu0 %1643  ;;  %2694 = vmatprep.subr.msk.bf16.mxu0 %vm1432_vm11, %v1427_v12  ;;  %2818 = vmatpush3.bf16.msra.mxu1 %v1440_v14  ;;  %v276_v14 = vld [vmem:[%s3575_s3 + $0x1c] sm:$0xf] }
 0x2d1   : > { %1443 = vmatpush1.bf16.msra.mxu0 %v1434_v16  ;;  %2823 = vmatprep.subr.bf16.mxu1 %v3025_v0  ;;  %v285_v16 = vpack.c.bf16 %v276_v14, %v276_v14 }
 0x2d2   : > { %2697 = vmatprep.subr.msk.bf16.mxu0 %vm1432_vm11, %v3349_v8  ;;  %v1646_v6 = vpop.permute.xlu1 %1645 }
 0x2d3   : > { %2820 = vmatmul.mubr.msk.bf16.vlgmr.msra.gmra.mrb[36].mxu1 %vm1428_vm14, %v279_v15  ;;  %v1649_v2 = vsel %vm513_vm4, %v1644_v17, %v1646_v6 }
 0x2d4   : > { %v1648_v19 = vpop.permute.xlu0 %1647  ;;  %2695 = vmatmul.mubr.msk.bf16.vlgmr.msra.gmra.mrb[36].mxu0 %vm1428_vm14, %v279_v15  ;;  %2824 = vmatpush3.bf16.msra.mxu1 %v1533_v18  ;;  %v1655_v27 = vsel %vm1432_vm11, %v1649_v2, 0 }
 0x2d5   : > { %v1650_v22 = vsel %vm513_vm4, %v1646_v6, %v1648_v19  ;;  %1536 = vmatpush1.bf16.msra.mxu0 %v1527_v20  ;;  %2825 = vmatprep.mubr.msk.bf16.mxu1 %vm3026_vm0, %v3025_v0  ;;  %v1661_v25 = vsel %vm1432_vm11, %v1648_v19, 0  ;;  %v277_v19 = vld [vmem:[%s3575_s3 + $0x20] sm:$0xf] }
 0x2d6   : > { %2700 = vmatprep.subr.msk.bf16.mxu0 %vm1432_vm11, %v1650_v22  ;;  %v1775_v8 = vpop.permute.xlu1 %1774  ;;  %2829 = vmatprep.subr.bf16.mxu1 %v3025_v0  ;;  %v286_v20 = vpack.c.bf16 %v277_v19, %v277_v19 }
 0x2d7   : > { %1567 = vmatprep.mubr.bf16.mxu0 %v3027_v1 }
 0x2d8   : > { %v1777_v23 = vpop.permute.xlu0 %1776 }
 0x2d9   : > { %v1780_v33 = vsel %vm629_vm5, %v1775_v8, %v1777_v23 }
 0x2da   : > { %v1779_v24 = vpop.permute.xlu1 %1778  ;;  %v1786_v36 = vsel %vm1432_vm11, %v1780_v33, 0 }
 0x2db   : > { %v1781_v26 = vsel %vm629_vm5, %v1777_v23, %v1779_v24  ;;  %2826 = vmatmul.mubr.msk.bf16.vlgmr.msra.gmra.mrb[40].mxu1 %vm1428_vm14, %v278_v11  ;;  %v1792_v35 = vsel %vm1432_vm11, %v1779_v24, 0 }
 0x2dc   : > { %2830 = vmatpush3.bf16.msra.mxu1 %v1661_v25  ;;  %v1906_v28 = vpop.permute.xlu0 %1905  ;;  %2698 = vmatmul.mubr.msk.bf16.vlgmr.msra.gmra.mrb[40].mxu0 %vm1428_vm14, %v278_v11 }
 0x2dd   : > { %1664 = vmatpush1.bf16.msra.mxu0 %v1655_v27  ;;  %2831 = vmatprep.mubr.msk.bf16.mxu1 %vm3026_vm0, %v3025_v0 }
 0x2de   : > { %2703 = vmatprep.subr.msk.bf16.mxu0 %vm1432_vm11, %v1781_v26  ;;  %v1908_v30 = vpop.permute.xlu1 %1907  ;;  %2835 = vmatprep.subr.bf16.mxu1 %v3025_v0 }
 0x2df   : > { %1695 = vmatprep.mubr.bf16.mxu0 %v3027_v1  ;;  %v1911_v42 = vsel %vm746_vm6, %v1906_v28, %v1908_v30 }
 0x2e0   : > { %v1910_v32 = vpop.permute.xlu0 %1909  ;;  %v1917_v45 = vsel %vm1432_vm11, %v1911_v42, 0 }
 0x2e1   : > { %v1912_v39 = vsel %vm746_vm6, %v1908_v30, %v1910_v32  ;;  %v1923_v44 = vsel %vm1432_vm11, %v1910_v32, 0 }
 0x2e2   : > { %v2037_v34 = vpop.permute.xlu1 %2036 }
 0x2e3   : > { %2832 = vmatmul.mubr.msk.bf16.vlgmr.msra.gmra.mrb[44].mxu1 %vm1428_vm14, %v280_v31 }
 0x2e4   : > { %2836 = vmatpush3.bf16.msra.mxu1 %v1792_v35  ;;  %v2039_v37 = vpop.permute.xlu0 %2038  ;;  %2701 = vmatmul.mubr.msk.bf16.vlgmr.msra.gmra.mrb[44].mxu0 %vm1428_vm14, %v280_v31 }
 0x2e5   : > { %1795 = vmatpush1.bf16.msra.mxu0 %v1786_v36  ;;  %2837 = vmatprep.mubr.msk.bf16.mxu1 %vm3026_vm0, %v3025_v0  ;;  %v2042_v52 = vsel %vm862_vm7, %v2037_v34, %v2039_v37 }
 0x2e6   : > { %2706 = vmatprep.subr.msk.bf16.mxu0 %vm1432_vm11, %v1912_v39  ;;  %2841 = vmatprep.subr.bf16.mxu1 %v3025_v0  ;;  %v2041_v41 = vpop.permute.xlu1 %2040  ;;  %v2048_v54 = vsel %vm1432_vm11, %v2042_v52, 0 }
 0x2e7   : > { %1826 = vmatprep.mubr.bf16.mxu0 %v3027_v1  ;;  %v2043_v47 = vsel %vm862_vm7, %v2039_v37, %v2041_v41  ;;  %v2054_v53 = vsel %vm1432_vm11, %v2041_v41, 0 }
 0x2e8   : > { %v2168_v43 = vpop.permute.xlu0 %2167 }
 0x2ea   : > { %v2170_v48 = vpop.permute.xlu1 %2169 }
 0x2eb   : > { %2838 = vmatmul.mubr.msk.bf16.vlgmr.msra.gmra.mrb[48].mxu1 %vm1428_vm14, %v281_v40  ;;  %v2173_v60 = vsel %vm978_vm8, %v2168_v43, %v2170_v48 }
 0x2ec   : > { %2842 = vmatpush3.bf16.msra.mxu1 %v1923_v44  ;;  %2704 = vmatmul.mubr.msk.bf16.vlgmr.msra.gmra.mrb[48].mxu0 %vm1428_vm14, %v281_v40  ;;  %v2172_v51 = vpop.permute.xlu0 %2171  ;;  %v2179_v63 = vsel %vm1432_vm11, %v2173_v60, 0 }
 0x2ed   : > { %1926 = vmatpush1.bf16.msra.mxu0 %v1917_v45  ;;  %2843 = vmatprep.mubr.msk.bf16.mxu1 %vm3026_vm0, %v3025_v0  ;;  %v2174_v57 = vsel %vm978_vm8, %v2170_v48, %v2172_v51  ;;  %v2185_v62 = vsel %vm1432_vm11, %v2172_v51, 0 }
 0x2ee   : > { %2709 = vmatprep.subr.msk.bf16.mxu0 %vm1432_vm11, %v2043_v47  ;;  %2847 = vmatprep.subr.bf16.mxu1 %v3025_v0  ;;  %v2299_v55 = vpop.permute.xlu1 %2298 }
 0x2ef   : > { %1957 = vmatprep.mubr.bf16.mxu0 %v3027_v1 }
 0x2f0   : > { %v2301_v58 = vpop.permute.xlu0 %2300 }
 0x2f1   : > { %v2304_v9 = vsel %vm1094_vm9, %v2299_v55, %v2301_v58 }
 0x2f2   : > { %v2303_v61 = vpop.permute.xlu1 %2302  ;;  %v2310_v3 = vsel %vm1432_vm11, %v2304_v9, 0 }
 0x2f3   : > { %2844 = vmatmul.mubr.msk.bf16.vlgmr.msra.gmra.mrb[52].mxu1 %vm1428_vm14, %v282_v49  ;;  %v2305_v7 = vsel %vm1094_vm9, %v2301_v58, %v2303_v61  ;;  %v2316_v13 = vsel %vm1432_vm11, %v2303_v61, 0 }
 0x2f4   : > { %2848 = vmatpush3.bf16.msra.mxu1 %v2054_v53  ;;  %2707 = vmatmul.mubr.msk.bf16.vlgmr.msra.gmra.mrb[52].mxu0 %vm1428_vm14, %v282_v49  ;;  %v2430_v4 = vpop.permute.xlu0 %2429 }
 0x2f5   : > { %2057 = vmatpush1.bf16.msra.mxu0 %v2048_v54  ;;  %2849 = vmatprep.mubr.msk.bf16.mxu1 %vm3026_vm0, %v3025_v0 }
 0x2f6   : > { %2712 = vmatprep.subr.msk.bf16.mxu0 %vm1432_vm11, %v2174_v57  ;;  %2853 = vmatprep.subr.bf16.mxu1 %v3025_v0  ;;  %v2432_v12 = vpop.permute.xlu1 %2431 }
 0x2f7   : > { %2088 = vmatprep.mubr.bf16.mxu0 %v3027_v1  ;;  %v2435_v17 = vsel %vm1210_vm10, %v2430_v4, %v2432_v12 }
 0x2f8   : > { %v2434_v10 = vpop.permute.xlu0 %2433  ;;  %v2441_v18 = vsel %vm1432_vm11, %v2435_v17, 0 }
 0x2f9   : > { %v2436_v15 = vsel %vm1210_vm10, %v2432_v12, %v2434_v10  ;;  %v2447_v6 = vsel %vm1432_vm11, %v2434_v10, 0 }
 0x2fb   : > { %2850 = vmatmul.mubr.msk.bf16.vlgmr.msra.gmra.mrb[56].mxu1 %vm1428_vm14, %v283_v59 }
 0x2fc   : > { %2854 = vmatpush3.bf16.msra.mxu1 %v2185_v62  ;;  %2710 = vmatmul.mubr.msk.bf16.vlgmr.msra.gmra.mrb[56].mxu0 %vm1428_vm14, %v283_v59 }
 0x2fd   : > { %2188 = vmatpush1.bf16.msra.mxu0 %v2179_v63  ;;  %2855 = vmatprep.mubr.msk.bf16.mxu1 %vm3026_vm0, %v3025_v0 }
 0x2fe   : > { %2715 = vmatprep.subr.msk.bf16.mxu0 %vm1432_vm11, %v2305_v7  ;;  %2859 = vmatprep.subr.bf16.mxu1 %v3025_v0 }
 0x2ff   : > { %2219 = vmatprep.mubr.bf16.mxu0 %v3027_v1 }
 0x303   : > { %2856 = vmatmul.mubr.msk.bf16.vlgmr.msra.gmra.mrb[60].mxu1 %vm1428_vm14, %v284_v50 }
 0x304   : > { %2860 = vmatpush3.bf16.msra.mxu1 %v2316_v13  ;;  %2713 = vmatmul.mubr.msk.bf16.vlgmr.msra.gmra.mrb[60].mxu0 %vm1428_vm14, %v284_v50 }
 0x305   : > { %2319 = vmatpush1.bf16.msra.mxu0 %v2310_v3  ;;  %2861 = vmatprep.mubr.msk.bf16.mxu1 %vm3026_vm0, %v3025_v0 }
 0x306   : > { %2718 = vmatprep.subr.msk.bf16.mxu0 %vm1432_vm11, %v2436_v15  ;;  %2865 = vmatprep.subr.bf16.mxu1 %v3025_v0 }
 0x307   : > { %2350 = vmatprep.mubr.bf16.mxu0 %v3027_v1 }
 0x30b   : > { %2862 = vmatmul.mubr.msk.bf16.vlgmr.msra.gmra.mrb[64].mxu1 %vm1428_vm14, %v285_v16 }
 0x30c   : > { %2866 = vmatpush3.bf16.msra.mxu1 %v2447_v6  ;;  %2716 = vmatmul.mubr.msk.bf16.vlgmr.msra.gmra.mrb[64].mxu0 %vm1428_vm14, %v285_v16 }
 0x30d   : > { %2450 = vmatpush1.bf16.msra.mxu0 %v2441_v18  ;;  %2867 = vmatprep.mubr.msk.bf16.mxu1 %vm3026_vm0, %v3025_v0  ;;  %vm2583_vm0 = vcmask 551936  }
 0x30e   : > { %2481 = vmatprep.mubr.bf16.mxu0 %v3027_v1 }
 0x313   : > { %2868 = vmatmul.mubr.msk.bf16.vlgmr.msra.gmra.mrb[68].mxu1 %vm1428_vm14, %v286_v20 }
 0x314   : > { %2719 = vmatmul.mubr.msk.bf16.vlgmr.msra.gmra.mrb[68].mxu0 %vm1428_vm14, %v286_v20 }
 0x3a6   : > { %v1517_v21 = vpop.f32.mrb[36].mxu1 }
 0x3a7   : > { %v1476_v22 = vpop.f32.mrb[36].mxu0  ;;  %v2821_v8 = vpop.f32.mrb[37].mxu1 }
 0x3a8   : > { %v1478_v11 = vpop.f32.mrb[37].mxu0  ;;  %v1520_v23 = vpop.f32.mrb[38].mxu1 }
 0x3a9   : > { %v1480_v2 = vpop.f32.mrb[38].mxu0  ;;  %v2822_v24 = vpop.f32.mrb[39].mxu1 }
 0x3aa   : > { %v1481_v25 = vpop.f32.mrb[39].mxu0 }
 0x3ae   : > { %v1610_v26 = vpop.f32.mrb[40].mxu1 }
 0x3af   : > { %v1569_v27 = vpop.f32.mrb[40].mxu0  ;;  %v1611_v28 = vadd.f32 %v1610_v26, %v1517_v21  ;;  %v2827_v29 = vpop.f32.mrb[41].mxu1 }
 0x3b0   : > { %v1570_v0 = vadd.f32 %v1569_v27, %v1476_v22  ;;  %v1571_v30 = vpop.f32.mrb[41].mxu0  ;;  %v1613_v1 = vpop.f32.mrb[42].mxu1 }
 0x3b1   : > { %v1572_v31 = vadd.f32 %v1571_v30, %v1478_v11  ;;  %v1573_v32 = vpop.f32.mrb[42].mxu0  ;;  %v2828_v33 = vpop.f32.mrb[43].mxu1 }
 0x3b2   : > { %v1574_v34 = vpop.f32.mrb[43].mxu0 }
 0x3b6   : > { %v1738_v35 = vpop.f32.mrb[44].mxu1 }
 0x3b7   : > { %v1746_v36 = vadd.f32 %v1738_v35, %v1611_v28  ;;  %v1697_v37 = vpop.f32.mrb[44].mxu0  ;;  %v2833_v38 = vpop.f32.mrb[45].mxu1 }
 0x3b8   : > { %v1744_v39 = vadd.f32 %v1697_v37, %v1570_v0  ;;  %v1699_v40 = vpop.f32.mrb[45].mxu0  ;;  %v1741_v41 = vpop.f32.mrb[46].mxu1 }
 0x3b9   : > { %v1745_v42 = vadd.f32 %v1699_v40, %v1572_v31  ;;  %v1701_v43 = vpop.f32.mrb[46].mxu0  ;;  %v2834_v44 = vpop.f32.mrb[47].mxu1 }
 0x3ba   : > { %v1702_v45 = vpop.f32.mrb[47].mxu0  ;;  %v2537_v38 = vpop.permute.xlu1 %2536 }
 0x3be   : > { %v1869_v46 = vpop.f32.mrb[48].mxu1 }
 0x3bf   : > { %v1877_v47 = vadd.f32 %v1869_v46, %v1746_v36  ;;  %v1828_v48 = vpop.f32.mrb[48].mxu0  ;;  %v2839_v49 = vpop.f32.mrb[49].mxu1 }
 0x3c0   : > { %v1875_v51 = vadd.f32 %v1828_v48, %v1744_v39  ;;  %v1830_v52 = vpop.f32.mrb[49].mxu0  ;;  %v1872_v53 = vpop.f32.mrb[50].mxu1 }
 0x3c1   : > { %v1876_v54 = vadd.f32 %v1830_v52, %v1745_v42  ;;  %v1832_v55 = vpop.f32.mrb[50].mxu0  ;;  %v2840_v56 = vpop.f32.mrb[51].mxu1 }
 0x3c2   : > { %v1833_v57 = vpop.f32.mrb[51].mxu0 }
 0x3c6   : > { %v2000_v58 = vpop.f32.mrb[52].mxu1 }
 0x3c7   : > { %v2008_v59 = vadd.f32 %v2000_v58, %v1877_v47  ;;  %v1959_v60 = vpop.f32.mrb[52].mxu0  ;;  %v2845_v61 = vpop.f32.mrb[53].mxu1 }
 0x3c8   : > { %v2006_v62 = vadd.f32 %v1959_v60, %v1875_v51  ;;  %v1961_v63 = vpop.f32.mrb[53].mxu0  ;;  %v2003_v4 = vpop.f32.mrb[54].mxu1 }
 0x3c9   : > { %v2007_v5 = vadd.f32 %v1961_v63, %v1876_v54  ;;  %v1963_v7 = vpop.f32.mrb[54].mxu0  ;;  %v2846_v50 = vpop.f32.mrb[55].mxu1 }
 0x3ca   : > { %v1964_v9 = vpop.f32.mrb[55].mxu0 }
 0x3ce   : > { %v2131_v10 = vpop.f32.mrb[56].mxu1 }
 0x3cf   : > { %v2139_v13 = vadd.f32 %v2131_v10, %v2008_v59  ;;  %v2090_v3 = vpop.f32.mrb[56].mxu0  ;;  %v2851_v12 = vpop.f32.mrb[57].mxu1 }
 0x3d0   : > { %v2137_v14 = vadd.f32 %v2090_v3, %v2006_v62  ;;  %v2092_v15 = vpop.f32.mrb[57].mxu0  ;;  %v2134_v16 = vpop.f32.mrb[58].mxu1 }
 0x3d1   : > { %v2138_v17 = vadd.f32 %v2092_v15, %v2007_v5  ;;  %v2094_v6 = vpop.f32.mrb[58].mxu0  ;;  %v2852_v18 = vpop.f32.mrb[59].mxu1 }
 0x3d2   : > { %v2095_v19 = vpop.f32.mrb[59].mxu0  ;;  %v2564_v62 = vpop.permute.xlu0 %2563 }
 0x3d3   : > { %v2566_v5 = vpop.permute.xlu1 %2565 }
 0x3d6   : > { %v2262_v20 = vpop.f32.mrb[60].mxu1  ;;  %v2568_v63 = vpop.permute.xlu0 %2567 }
 0x3d7   : > { %v2270_v21 = vadd.f32 %v2262_v20, %v2139_v13  ;;  %v2221_v22 = vpop.f32.mrb[60].mxu0  ;;  %v2857_v8 = vpop.f32.mrb[61].mxu1  ;;  %v2571_v13 = vsel %vm746_vm6, %v2566_v5, %v2568_v63 }
 0x3d8   : > { %v2268_v11 = vadd.f32 %v2221_v22, %v2137_v14  ;;  %v2223_v23 = vpop.f32.mrb[61].mxu0  ;;  %v2265_v2 = vpop.f32.mrb[62].mxu1  ;;  %v2570_v14 = vsel %vm746_vm6, %v2564_v62, %v2566_v5 }
 0x3d9   : > { %v2269_v24 = vadd.f32 %v2223_v23, %v2138_v17  ;;  %v2225_v25 = vpop.f32.mrb[62].mxu0  ;;  %v2858_v26 = vpop.f32.mrb[63].mxu1 }
 0x3da   : > { %v2226_v27 = vpop.f32.mrb[63].mxu0 }
 0x3de   : > { %v2393_v28 = vpop.f32.mrb[64].mxu1 }
 0x3df   : > { %v2401_v29 = vadd.f32 %v2393_v28, %v2270_v21  ;;  %v2352_v0 = vpop.f32.mrb[64].mxu0  ;;  %v2863_v30 = vpop.f32.mrb[65].mxu1 }
 0x3e0   : > { %v2399_v1 = vadd.f32 %v2352_v0, %v2268_v11  ;;  %v2354_v31 = vpop.f32.mrb[65].mxu0  ;;  %v2396_v32 = vpop.f32.mrb[66].mxu1 }
 0x3e1   : > { %v2400_v33 = vadd.f32 %v2354_v31, %v2269_v24  ;;  %v2356_v34 = vpop.f32.mrb[66].mxu0  ;;  %v2864_v35 = vpop.f32.mrb[67].mxu1 }
 0x3e2   : > { %v2357_v36 = vpop.f32.mrb[67].mxu0 }
 0x3e6   : > { %v2524_v37 = vpop.f32.mrb[68].mxu1 }
 0x3e7   : > { %v2532_v39 = vadd.f32 %v2524_v37, %v2401_v29  ;;  %v2483_v40 = vpop.f32.mrb[68].mxu0  ;;  %v2869_v41 = vpop.f32.mrb[69].mxu1 }
 0x3e8   : > { %v2530_v42 = vadd.f32 %v2483_v40, %v2399_v1  ;;  %v2485_v43 = vpop.f32.mrb[69].mxu0  ;;  %v2527_v44 = vpop.f32.mrb[70].mxu1 }
 0x3e9   : > { %v2531_v45 = vadd.f32 %v2485_v43, %v2400_v33  ;;  %v2541_v46 = vadd.f32 %v2537_v38, %v2532_v39  ;;  %v2487_v47 = vpop.f32.mrb[70].mxu0  ;;  %v2870_v48 = vpop.f32.mrb[71].mxu1 }
 0x3ea   : > { %v2539_v49 = vadd.f32 %v2537_v38, %v2530_v42  ;;  %v2488_v51 = vpop.f32.mrb[71].mxu0 }
 0x3eb   : > { %v2540_v52 = vadd.f32 %v2537_v38, %v2531_v45  ;;  %v2723_v53 = vmul.f32 -1.442695, %v2541_v46 }
 0x3ec   : > { %v2721_v54 = vmul.f32 -1.442695, %v2539_v49 }
 0x3ed   : > { %v2722_v55 = vmul.f32 -1.442695, %v2540_v52  ;;  %2949 = vpow2.f32 %v2723_v53 }
 0x3ee   : > { %2951 = vpow2.f32 %v2721_v54 }
 0x3ef   : > { %2953 = vpow2.f32 %v2722_v55 }
 0x3f7   : > { %v2950_v56 = vpop.eup %2949 }
 0x3f8   : > { %v2952_v57 = vpop.eup %2951  ;;  %v2553_v58 = vadd.f32 1.0, %v2950_v56 }
 0x3f9   : > { %v2954_v59 = vpop.eup %2953  ;;  %v2551_v60 = vadd.f32 1.0, %v2952_v57 }
 0x3fa   : > { %v2552_v61 = vadd.f32 1.0, %v2954_v59  ;;  %2955 = vrcp.f32 %v2553_v58 }
 0x3fb   : > { %2957 = vrcp.f32 %v2551_v60 }
 0x3fc   : > { %2959 = vrcp.f32 %v2552_v61 }
 0x404   : > { %v2956_v4 = vpop.eup %2955 }
 0x405   : > { %v2958_v7 = vpop.eup %2957  ;;  %v2562_v50 = vmul.f32 %v2956_v4, %v2541_v46 }
 0x406   : > { %v2960_v9 = vpop.eup %2959  ;;  %v2560_v10 = vmul.f32 %v2958_v7, %v2539_v49 }
 0x407   : > { %v2577_v3 = vadd.f32 %v2568_v63, %v2562_v50  ;;  %v2561_v12 = vmul.f32 %v2960_v9, %v2540_v52 }
 0x408   : > { %v2575_v15 = vadd.f32 %v2570_v14, %v2560_v10 }
 0x409   : > { %2584 = vst.msk [vmem:[%s244_s9 + $0x8] sm:$0xf] %vm2583_vm0, %v2577_v3  ;;  %v2576_v16 = vadd.f32 %v2571_v13, %v2561_v12 }
 0x40b   : > { %v2580_v17 = vcombine.low %v2575_v15, %v2576_v16 }
 0x40d   : > { %2582 = vst [vmem:[%s244_s9] sm:$0xff] %v2580_v17 }
 0x40e   : > { %2974 = shalt.err (!%p2971_p3)
}
 0x40f   : > { %s2975_s16 = scalar_lea.hbm %s3530_s13, 192  ;;  %s2979_s19 = scalar_lea.hbm %s3578_s6, 384 }
 0x410   : > { %p2976_p4 = scmp.ne.s32.totalorder %s3530_s13, %s2975_s16  ;;  %p2980_p9 = scmp.lt.u32.totalorder %s3530_s13, %s3578_s6 }
 0x411   : > { %p2981_p10 = scmp.lt.u32.totalorder %s2979_s19, %s2975_s16  ;;  %p2983_p12 = scmp.lt.u32.totalorder %s2975_s16, %s3530_s13 }
 0x412   : > { %p2977_p7 = pnand %p2976_p4, %p3112_p5 }
 0x413   : > { %p2982_p11 = por %p2981_p10, %p2980_p9 }
 0x414   : > { %p2978_p8 = pneg %p2977_p7 }
 0x415   : > { %p2984_p13 = por %p2983_p12, %p2982_p11 }
 0x417   : > { %p2985_p0 = pnand %p2984_p13, %p2978_p8 }
 0x419   : > { %2988 = shalt.err (!%p2985_p0)
}
 0x41a   : > { %2874 = dma.vmem_to_hbm [thread:$0]  (%p3112_p5), %s3532_s10, 192, %s3530_s13, %s2586_s28  }
 0x41b PF: > { %p2880_p1 = scmp.ge.s32.totalorder %s3023_s24, 2  ;;  %s2612_s9 = sand.u32 1, %s3011_s21  }
 0x41c   : > { %s2613_s11 = scalar_lea.sflag [#allocation4], %s2612_s9 }
 0x41d   : > { %p2877_p2 = pnand %p2880_p1, %p3116_p6 }
 0x41f   : > { %3006 = dma.done.wait (!%p2877_p2), %s2613_s11, 192  }
 0x420   : > { %3008 = vsyncadd (!%p2877_p2), %s2613_s11, 4294967104  ;;  %p16_p3 = scmp.ge.s32.totalorder %s3099_s27, 4   ;;  %s3581_s21 = smov %s3015_s22 }
 0x421   : > { %s3582_s22 = smov %s3019_s23  ;;  %s3583_s23 = smov %s3110_s30 }
 0x422   : > { %s3584_s24 = smov %s3099_s27  ;;  %18 = sbr.rel (!%p16_p3) target bundleno = 3 (0x3), region = 79 }
 0x429   :  { %2618 = vsyncpa [#allocation4], 1 }
 0x42a   :  { %2620 = vsyncpa [#allocation4 + $0x1], 1 }

</bundles_post_ra>
